<compile_context>
chip_gen: v7x
topology: tpu7x:2x2x1
jax: 0.10.0
libtpu: 0.0.40
codegen_flags: <defaults>
</compile_context>

<pallas_src>
import math

import jax
import jax.numpy as jnp
from jax import lax
from jax.experimental import pallas as pl
from jax.experimental.pallas import tpu as pltpu

EPS = 1e-5
MAXPAD = 2   # max 'same' padding among the in-kernel convs (conv_y, K=5)


# --------------------------------- kernel ------------------------------------ #
def gcn_embedding_kernel(
    xcols_ref,   # (N, L, KX*Cin)  im2col of the input, center tap first
    adj_ref,     # (N, N)          adjacency
    wxf_ref,     # (KX*Cin, Fp)    conv_x weight, flattened to match xcols
    wy_ref,      # (5, Fp, Fp)     conv_y weight (tap, in, out)
    wz_ref,      # (3, Fp, Fp)     conv_z weight
    ws_ref,      # (Cin, Fp)       1x1 shortcut conv weight
    bn_ref,      # (8, Fp)         BN params: rows 0..3 gamma, rows 4..7 beta
    gw_ref,      # (Fp, Fp)        GraphConvolution weight
    gb_ref,      # (1, Fp)         GraphConvolution bias
    out_ref,     # (1, Fp)         graph embedding (lane-dense)
    hpad_ref,    # scratch (N, L + 2*MAXPAD, Fp) zero-padded conv staging buffer
):
    N, L, KC = xcols_ref.shape
    Cin = ws_ref.shape[0]
    Fp = gw_ref.shape[0]
    maxpad = (hpad_ref.shape[1] - L) // 2
    inv_nl = 1.0 / (N * L)

    bn_p = bn_ref[...]

    def batch_norm(x, i):
        # Training-mode BN fused into a single pass: E[x], E[x^2] -> scale/shift.
        gamma = bn_p[i:i + 1, :].reshape(1, 1, Fp)
        beta = bn_p[4 + i:5 + i, :].reshape(1, 1, Fp)
        mean = jnp.sum(x, axis=(0, 1), keepdims=True) * inv_nl
        ex2 = jnp.sum(x * x, axis=(0, 1), keepdims=True) * inv_nl
        scale = gamma * lax.rsqrt(ex2 - mean * mean + EPS)
        shift = beta - mean * scale
        return x * scale + shift

    def conv_from_padded(w_ref):
        # 'same' conv via K shifted static slices of the zero-padded scratch;
        # each tap is one flattened (N*L, Fp) @ (Fp, Fp) MXU matmul, f32 acc.
        K = w_ref.shape[0]
        pad = (K - 1) // 2
        acc = None
        for k in range(K):
            s = maxpad + k - pad
            xk = hpad_ref[:, s:s + L, :].reshape(N * L, Fp)
            part = jnp.dot(xk, w_ref[k], preferred_element_type=jnp.float32)
            acc = part if acc is None else acc + part
        return acc.reshape(N, L, Fp)

    xcols = xcols_ref[...]

    # --- conv_x: single im2col matmul (bias omitted: cancelled by BN) ---
    h = jnp.dot(xcols.reshape(N * L, KC), wxf_ref[...],
                preferred_element_type=jnp.float32).reshape(N, L, Fp)
    h = jnp.maximum(batch_norm(h, 0), 0.0)

    # --- zero the staging buffer once; boundaries stay zero for both convs ---
    hpad_ref[...] = jnp.zeros(hpad_ref.shape, jnp.float32)

    # --- conv_y (K=5) -> BN -> ReLU ---
    hpad_ref[:, maxpad:maxpad + L, :] = h
    h = jnp.maximum(batch_norm(conv_from_padded(wy_ref), 1), 0.0)

    # --- conv_z (K=3) -> BN ---
    hpad_ref[:, maxpad:maxpad + L, :] = h
    h = batch_norm(conv_from_padded(wz_ref), 2)

    # --- shortcut: 1x1 conv on x (center tap = lanes [0:Cin]) -> BN ---
    x_center = xcols[:, :, 0:Cin]
    sc = jnp.dot(x_center.reshape(N * L, Cin), ws_ref[...],
                 preferred_element_type=jnp.float32).reshape(N, L, Fp)
    sc = batch_norm(sc, 3)

    h = jnp.maximum(h + sc, 0.0)                        # (N, L, Fp)

    # --- avg_pool1d over the full length -> node features (N, Fp) ---
    feats = jnp.sum(h, axis=1) * (1.0 / L)

    # --- graph conv + node mean, collapsed:
    #     mean_n(adj @ (feats @ W) + b) == (mean_row(adj) @ feats) @ W + b ---
    a = jnp.sum(adj_ref[...], axis=0, keepdims=True) * (1.0 / N)     # (1, N)
    pooled = jnp.dot(a, feats, preferred_element_type=jnp.float32)   # (1, Fp)
    out_ref[...] = (
        jnp.dot(pooled, gw_ref[...], preferred_element_type=jnp.float32)
        + gb_ref[...]
    )


# -------------------------------- wrapper ------------------------------------ #
def gcn_embedding_forward(x_nlc, adj, params):
    """x_nlc: (N, L, Cin) channels-last series; adj: (N, N); returns (F,)."""
    N, L, Cin = x_nlc.shape
    F = params["gw"].shape[0]
    Fp = max(128, ((F + 127) // 128) * 128)     # lane-dense feature dim
    KX = params["wx"].shape[0]
    pad_x = (KX - 1) // 2

    # im2col for conv_x (layout plumbing only), center tap first so the 1x1
    # shortcut conv can reuse lanes [0:Cin] without a lane rotate.
    taps = [pad_x] + [k for k in range(KX) if k != pad_x]
    xp = jnp.pad(x_nlc, ((0, 0), (pad_x, pad_x), (0, 0)))
    x_cols = jnp.concatenate([xp[:, t:t + L, :] for t in taps], axis=-1)

    def pad_f(w):       # zero-pad the trailing feature dim F -> Fp
        return jnp.pad(w, [(0, 0)] * (w.ndim - 1) + [(0, Fp - F)])

    def pad_ff(w):      # zero-pad the two trailing feature dims
        return jnp.pad(w, [(0, 0)] * (w.ndim - 2) + [(0, Fp - F), (0, Fp - F)])

    wxf = pad_f(jnp.concatenate([params["wx"][t] for t in taps], axis=0))
    wy = pad_ff(params["wy"])
    wz = pad_ff(params["wz"])
    ws = pad_f(params["ws"][0])
    # gamma/beta padded with 0 so padded channels stay exactly 0 through BN.
    bn_all = pad_f(jnp.concatenate([params["bn_g"], params["bn_b"]], axis=0))
    gw = pad_ff(params["gw"])
    gb = pad_f(params["gb"])
    # NOTE: conv biases are intentionally NOT passed to the kernel -- they are
    # cancelled exactly by the training-mode BatchNorm mean subtraction.

    inputs = (x_cols, adj, wxf, wy, wz, ws, bn_all, gw, gb)
    vmem = pl.BlockSpec(memory_space=pltpu.MemorySpace.VMEM)
    out = pl.pallas_call(
        gcn_embedding_kernel,
        out_shape=jax.ShapeDtypeStruct((1, Fp), jnp.float32),
        in_specs=[vmem] * len(inputs),
        out_specs=vmem,
        scratch_shapes=[pltpu.VMEM((N, L + 2 * MAXPAD, Fp), jnp.float32)],
    )(*inputs)
    return out[0, :F]   # slice the lane padding back off


# ------------------------ pure-JAX reference (for check) --------------------- #
def ref_forward(x_nlc, adj, p):
    def conv(x, w, b):
        K = w.shape[0]
        pad = (K - 1) // 2
        L = x.shape[1]
        xp = jnp.pad(x, ((0, 0), (pad, pad), (0, 0)))
        out = sum(
            jnp.einsum("nlc,cf->nlf", xp[:, k : k + L, :], w[k]) for k in range(K)
        )
        return out + b.reshape(1, 1, -1)

    def bn(x, g, bta):
        m = x.mean(axis=(0, 1), keepdims=True)
        v = ((x - m) ** 2).mean(axis=(0, 1), keepdims=True)
        return g.reshape(1, 1, -1) * (x - m) / jnp.sqrt(v + EPS) + bta.reshape(1, 1, -1)

    relu = jax.nn.relu
    h = relu(bn(conv(x_nlc, p["wx"], p["cb"][0]), p["bn_g"][0], p["bn_b"][0]))
    h = relu(bn(conv(h, p["wy"], p["cb"][1]), p["bn_g"][1], p["bn_b"][1]))
    h = bn(conv(h, p["wz"], p["cb"][2]), p["bn_g"][2], p["bn_b"][2])
    sc = bn(conv(x_nlc, p["ws"], p["cb"][3]), p["bn_g"][3], p["bn_b"][3])
    h = relu(h + sc)
    feats = h.mean(axis=1)
    gout = adj @ (feats @ p["gw"]) + p["gb"]
    return gout.mean(axis=0)


# ---------------------------------- main -------------------------------------- #
if __name__ == "__main__":
    # N nodes, input_size channels, series length L, n_feature_maps=64,
    # num_layers=1 (module default) -- only block_1 + gc1 are exercised.
    N, Cin, L, F = 8, 4, 16, 64

    key = jax.random.PRNGKey(0)
    ks = jax.random.split(key, 10)

    def uni(k, shape, bound):
        return jax.random.uniform(k, shape, jnp.float32, -bound, bound)

    params = dict(
        wx=uni(ks[0], (7, Cin, F), 1.0 / math.sqrt(Cin * 7)),
        wy=uni(ks[1], (5, F, F), 1.0 / math.sqrt(F * 5)),
        wz=uni(ks[2], (3, F, F), 1.0 / math.sqrt(F * 3)),
        ws=uni(ks[3], (1, Cin, F), 1.0 / math.sqrt(Cin)),
        cb=uni(ks[4], (4, F), 0.1),          # conv biases: reference only
        bn_g=jnp.ones((4, F), jnp.float32),  # BatchNorm default init
        bn_b=jnp.zeros((4, F), jnp.float32),
        gw=uni(ks[5], (F, F), 1.0 / math.sqrt(F)),
        gb=uni(ks[6], (1, F), 1.0 / math.sqrt(F)),
    )

    x_ncl = jax.random.normal(ks[7], (N, Cin, L), jnp.float32)  # PyTorch (N, C, L)
    x_nlc = jnp.transpose(x_ncl, (0, 2, 1))                      # kernel layout
    adj = jax.random.uniform(ks[8], (N, N), jnp.float32)
    adj = adj / jnp.sum(adj, axis=1, keepdims=True)              # row-normalized adj

    emb = gcn_embedding_forward(x_nlc, adj, params)
    emb = jax.block_until_ready(emb)

    ref = ref_forward(x_nlc, adj, params)
    assert emb.shape == (F,)
    assert bool(jnp.allclose(emb, ref, atol=1e-3, rtol=1e-3)), "mismatch vs reference"

    print("KERNEL_OK")
</pallas_src>

<mosaic_0001>
module attributes {stable_mosaic.version = 11 : i64} {
  func.func @gcn_embedding_kernel(%arg0: memref<8x16x28xf32, #tpu.memory_space<vmem>>, %arg1: memref<8x8xf32, #tpu.memory_space<vmem>>, %arg2: memref<28x128xf32, #tpu.memory_space<vmem>>, %arg3: memref<5x128x128xf32, #tpu.memory_space<vmem>>, %arg4: memref<3x128x128xf32, #tpu.memory_space<vmem>>, %arg5: memref<4x128xf32, #tpu.memory_space<vmem>>, %arg6: memref<8x128xf32, #tpu.memory_space<vmem>>, %arg7: memref<128x128xf32, #tpu.memory_space<vmem>>, %arg8: memref<1x128xf32, #tpu.memory_space<vmem>>, %arg9: memref<1x128xf32, #tpu.memory_space<vmem>>, %arg10: memref<8x20x128xf32, #tpu.memory_space<vmem>>) attributes {dimension_semantics = [], scalar_prefetch = 0 : i64, scratch_operands = 1 : i64, tpu.core_type = #tpu.core_type<tc>} {
    %c0 = arith.constant 0 : index
    %c0_0 = arith.constant 0 : index
    %0 = vector.load %arg6[%c0, %c0_0] : memref<8x128xf32, #tpu.memory_space<vmem>>, vector<8x128xf32>
    %c0_1 = arith.constant 0 : index
    %c0_2 = arith.constant 0 : index
    %c0_3 = arith.constant 0 : index
    %1 = vector.load %arg0[%c0_1, %c0_2, %c0_3] : memref<8x16x28xf32, #tpu.memory_space<vmem>>, vector<8x16x28xf32>
    %2 = vector.shape_cast %1 : vector<8x16x28xf32> to vector<128x28xf32>
    %c0_4 = arith.constant 0 : index
    %c0_5 = arith.constant 0 : index
    %3 = vector.load %arg2[%c0_4, %c0_5] : memref<28x128xf32, #tpu.memory_space<vmem>>, vector<28x128xf32>
    %cst = arith.constant dense<0.000000e+00> : vector<128x128xf32>
    %4 = tpu.matmul %2, %3, %cst {dimension_numbers = #tpu.dot_dimension_numbers<[1], [0], [0], [1], [0, 0, 1, 1], [], []>} : vector<128x28xf32>, vector<28x128xf32>, vector<128x128xf32> -> vector<128x128xf32>
    %5 = vector.shape_cast %4 : vector<128x128xf32> to vector<8x16x128xf32>
    %6 = vector.extract_strided_slice %0 {offsets = [0, 0], sizes = [1, 128], strides = [1, 1]} : vector<8x128xf32> to vector<1x128xf32>
    %7 = vector.shape_cast %6 : vector<1x128xf32> to vector<1x1x128xf32>
    %8 = vector.extract_strided_slice %0 {offsets = [4, 0], sizes = [1, 128], strides = [1, 1]} : vector<8x128xf32> to vector<1x128xf32>
    %9 = vector.shape_cast %8 : vector<1x128xf32> to vector<1x1x128xf32>
    %cst_6 = arith.constant dense<0.000000e+00> : vector<128xf32>
    %10 = vector.multi_reduction <add>, %5, %cst_6 [0, 1] : vector<8x16x128xf32> to vector<128xf32>
    %11 = vector.shape_cast %10 : vector<128xf32> to vector<1x1x128xf32>
    %cst_7 = arith.constant 7.812500e-03 : f32
    %12 = vector.broadcast %cst_7 : f32 to vector<1x1x128xf32>
    %13 = arith.mulf %11, %12 : vector<1x1x128xf32>
    %14 = arith.mulf %5, %5 : vector<8x16x128xf32>
    %cst_8 = arith.constant dense<0.000000e+00> : vector<128xf32>
    %15 = vector.multi_reduction <add>, %14, %cst_8 [0, 1] : vector<8x16x128xf32> to vector<128xf32>
    %16 = vector.shape_cast %15 : vector<128xf32> to vector<1x1x128xf32>
    %cst_9 = arith.constant 7.812500e-03 : f32
    %17 = vector.broadcast %cst_9 : f32 to vector<1x1x128xf32>
    %18 = arith.mulf %16, %17 : vector<1x1x128xf32>
    %19 = arith.mulf %13, %13 : vector<1x1x128xf32>
    %20 = arith.subf %18, %19 : vector<1x1x128xf32>
    %cst_10 = arith.constant 9.99999974E-6 : f32
    %21 = vector.broadcast %cst_10 : f32 to vector<1x1x128xf32>
    %22 = arith.addf %20, %21 : vector<1x1x128xf32>
    %23 = math.rsqrt %22 : vector<1x1x128xf32>
    %24 = arith.mulf %7, %23 : vector<1x1x128xf32>
    %25 = arith.mulf %13, %24 : vector<1x1x128xf32>
    %26 = arith.subf %9, %25 : vector<1x1x128xf32>
    %27 = vector.broadcast %24 : vector<1x1x128xf32> to vector<8x16x128xf32>
    %28 = arith.mulf %5, %27 : vector<8x16x128xf32>
    %29 = vector.broadcast %26 : vector<1x1x128xf32> to vector<8x16x128xf32>
    %30 = arith.addf %28, %29 : vector<8x16x128xf32>
    %cst_11 = arith.constant 0.000000e+00 : f32
    %31 = vector.broadcast %cst_11 : f32 to vector<8x16x128xf32>
    %32 = arith.maximumf %30, %31 : vector<8x16x128xf32>
    %cst_12 = arith.constant 0.000000e+00 : f32
    %33 = vector.broadcast %cst_12 : f32 to vector<8x20x128xf32>
    %c0_13 = arith.constant 0 : index
    %c0_14 = arith.constant 0 : index
    %c0_15 = arith.constant 0 : index
    %34 = vector.load %arg10[%c0_13, %c0_14, %c0_15] : memref<8x20x128xf32, #tpu.memory_space<vmem>>, vector<8x20x128xf32>
    tpu.vector_store %arg10[%c0_13, %c0_14, %c0_15], %33 {strides = array<i32>} : memref<8x20x128xf32, #tpu.memory_space<vmem>>, vector<8x20x128xf32>,
    %c0_16 = arith.constant 0 : index
    %c2 = arith.constant 2 : index
    %c0_17 = arith.constant 0 : index
    %35 = vector.load %arg10[%c0_16, %c2, %c0_17] : memref<8x20x128xf32, #tpu.memory_space<vmem>>, vector<8x16x128xf32>
    tpu.vector_store %arg10[%c0_16, %c2, %c0_17], %32 {strides = array<i32>} : memref<8x20x128xf32, #tpu.memory_space<vmem>>, vector<8x16x128xf32>,
    %c0_18 = arith.constant 0 : index
    %c0_19 = arith.constant 0 : index
    %c0_20 = arith.constant 0 : index
    %36 = vector.load %arg10[%c0_18, %c0_19, %c0_20] : memref<8x20x128xf32, #tpu.memory_space<vmem>>, vector<8x16x128xf32>
    %37 = vector.shape_cast %36 : vector<8x16x128xf32> to vector<128x128xf32>
    %c0_21 = arith.constant 0 : index
    %c0_22 = arith.constant 0 : index
    %c0_23 = arith.constant 0 : index
    %38 = vector.load %arg3[%c0_21, %c0_22, %c0_23] : memref<5x128x128xf32, #tpu.memory_space<vmem>>, vector<1x128x128xf32>
    %39 = vector.shape_cast %38 : vector<1x128x128xf32> to vector<128x128xf32>
    %cst_24 = arith.constant dense<0.000000e+00> : vector<128x128xf32>
    %40 = tpu.matmul %37, %39, %cst_24 {dimension_numbers = #tpu.dot_dimension_numbers<[1], [0], [0], [1], [0, 0, 1, 1], [], []>} : vector<128x128xf32>, vector<128x128xf32>, vector<128x128xf32> -> vector<128x128xf32>
    %c0_25 = arith.constant 0 : index
    %c1 = arith.constant 1 : index
    %c0_26 = arith.constant 0 : index
    %41 = vector.load %arg10[%c0_25, %c1, %c0_26] : memref<8x20x128xf32, #tpu.memory_space<vmem>>, vector<8x16x128xf32>
    %42 = vector.shape_cast %41 : vector<8x16x128xf32> to vector<128x128xf32>
    %c1_27 = arith.constant 1 : index
    %c0_28 = arith.constant 0 : index
    %c0_29 = arith.constant 0 : index
    %43 = vector.load %arg3[%c1_27, %c0_28, %c0_29] : memref<5x128x128xf32, #tpu.memory_space<vmem>>, vector<1x128x128xf32>
    %44 = vector.shape_cast %43 : vector<1x128x128xf32> to vector<128x128xf32>
    %cst_30 = arith.constant dense<0.000000e+00> : vector<128x128xf32>
    %45 = tpu.matmul %42, %44, %cst_30 {dimension_numbers = #tpu.dot_dimension_numbers<[1], [0], [0], [1], [0, 0, 1, 1], [], []>} : vector<128x128xf32>, vector<128x128xf32>, vector<128x128xf32> -> vector<128x128xf32>
    %46 = arith.addf %40, %45 : vector<128x128xf32>
    %c0_31 = arith.constant 0 : index
    %c2_32 = arith.constant 2 : index
    %c0_33 = arith.constant 0 : index
    %47 = vector.load %arg10[%c0_31, %c2_32, %c0_33] : memref<8x20x128xf32, #tpu.memory_space<vmem>>, vector<8x16x128xf32>
    %48 = vector.shape_cast %47 : vector<8x16x128xf32> to vector<128x128xf32>
    %c2_34 = arith.constant 2 : index
    %c0_35 = arith.constant 0 : index
    %c0_36 = arith.constant 0 : index
    %49 = vector.load %arg3[%c2_34, %c0_35, %c0_36] : memref<5x128x128xf32, #tpu.memory_space<vmem>>, vector<1x128x128xf32>
    %50 = vector.shape_cast %49 : vector<1x128x128xf32> to vector<128x128xf32>
    %cst_37 = arith.constant dense<0.000000e+00> : vector<128x128xf32>
    %51 = tpu.matmul %48, %50, %cst_37 {dimension_numbers = #tpu.dot_dimension_numbers<[1], [0], [0], [1], [0, 0, 1, 1], [], []>} : vector<128x128xf32>, vector<128x128xf32>, vector<128x128xf32> -> vector<128x128xf32>
    %52 = arith.addf %46, %51 : vector<128x128xf32>
    %c0_38 = arith.constant 0 : index
    %c3 = arith.constant 3 : index
    %c0_39 = arith.constant 0 : index
    %53 = vector.load %arg10[%c0_38, %c3, %c0_39] : memref<8x20x128xf32, #tpu.memory_space<vmem>>, vector<8x16x128xf32>
    %54 = vector.shape_cast %53 : vector<8x16x128xf32> to vector<128x128xf32>
    %c3_40 = arith.constant 3 : index
    %c0_41 = arith.constant 0 : index
    %c0_42 = arith.constant 0 : index
    %55 = vector.load %arg3[%c3_40, %c0_41, %c0_42] : memref<5x128x128xf32, #tpu.memory_space<vmem>>, vector<1x128x128xf32>
    %56 = vector.shape_cast %55 : vector<1x128x128xf32> to vector<128x128xf32>
    %cst_43 = arith.constant dense<0.000000e+00> : vector<128x128xf32>
    %57 = tpu.matmul %54, %56, %cst_43 {dimension_numbers = #tpu.dot_dimension_numbers<[1], [0], [0], [1], [0, 0, 1, 1], [], []>} : vector<128x128xf32>, vector<128x128xf32>, vector<128x128xf32> -> vector<128x128xf32>
    %58 = arith.addf %52, %57 : vector<128x128xf32>
    %c0_44 = arith.constant 0 : index
    %c4 = arith.constant 4 : index
    %c0_45 = arith.constant 0 : index
    %59 = vector.load %arg10[%c0_44, %c4, %c0_45] : memref<8x20x128xf32, #tpu.memory_space<vmem>>, vector<8x16x128xf32>
    %60 = vector.shape_cast %59 : vector<8x16x128xf32> to vector<128x128xf32>
    %c4_46 = arith.constant 4 : index
    %c0_47 = arith.constant 0 : index
    %c0_48 = arith.constant 0 : index
    %61 = vector.load %arg3[%c4_46, %c0_47, %c0_48] : memref<5x128x128xf32, #tpu.memory_space<vmem>>, vector<1x128x128xf32>
    %62 = vector.shape_cast %61 : vector<1x128x128xf32> to vector<128x128xf32>
    %cst_49 = arith.constant dense<0.000000e+00> : vector<128x128xf32>
    %63 = tpu.matmul %60, %62, %cst_49 {dimension_numbers = #tpu.dot_dimension_numbers<[1], [0], [0], [1], [0, 0, 1, 1], [], []>} : vector<128x128xf32>, vector<128x128xf32>, vector<128x128xf32> -> vector<128x128xf32>
    %64 = arith.addf %58, %63 : vector<128x128xf32>
    %65 = vector.shape_cast %64 : vector<128x128xf32> to vector<8x16x128xf32>
    %66 = vector.extract_strided_slice %0 {offsets = [1, 0], sizes = [1, 128], strides = [1, 1]} : vector<8x128xf32> to vector<1x128xf32>
    %67 = vector.shape_cast %66 : vector<1x128xf32> to vector<1x1x128xf32>
    %68 = vector.extract_strided_slice %0 {offsets = [5, 0], sizes = [1, 128], strides = [1, 1]} : vector<8x128xf32> to vector<1x128xf32>
    %69 = vector.shape_cast %68 : vector<1x128xf32> to vector<1x1x128xf32>
    %cst_50 = arith.constant dense<0.000000e+00> : vector<128xf32>
    %70 = vector.multi_reduction <add>, %65, %cst_50 [0, 1] : vector<8x16x128xf32> to vector<128xf32>
    %71 = vector.shape_cast %70 : vector<128xf32> to vector<1x1x128xf32>
    %cst_51 = arith.constant 7.812500e-03 : f32
    %72 = vector.broadcast %cst_51 : f32 to vector<1x1x128xf32>
    %73 = arith.mulf %71, %72 : vector<1x1x128xf32>
    %74 = arith.mulf %65, %65 : vector<8x16x128xf32>
    %cst_52 = arith.constant dense<0.000000e+00> : vector<128xf32>
    %75 = vector.multi_reduction <add>, %74, %cst_52 [0, 1] : vector<8x16x128xf32> to vector<128xf32>
    %76 = vector.shape_cast %75 : vector<128xf32> to vector<1x1x128xf32>
    %cst_53 = arith.constant 7.812500e-03 : f32
    %77 = vector.broadcast %cst_53 : f32 to vector<1x1x128xf32>
    %78 = arith.mulf %76, %77 : vector<1x1x128xf32>
    %79 = arith.mulf %73, %73 : vector<1x1x128xf32>
    %80 = arith.subf %78, %79 : vector<1x1x128xf32>
    %cst_54 = arith.constant 9.99999974E-6 : f32
    %81 = vector.broadcast %cst_54 : f32 to vector<1x1x128xf32>
    %82 = arith.addf %80, %81 : vector<1x1x128xf32>
    %83 = math.rsqrt %82 : vector<1x1x128xf32>
    %84 = arith.mulf %67, %83 : vector<1x1x128xf32>
    %85 = arith.mulf %73, %84 : vector<1x1x128xf32>
    %86 = arith.subf %69, %85 : vector<1x1x128xf32>
    %87 = vector.broadcast %84 : vector<1x1x128xf32> to vector<8x16x128xf32>
    %88 = arith.mulf %65, %87 : vector<8x16x128xf32>
    %89 = vector.broadcast %86 : vector<1x1x128xf32> to vector<8x16x128xf32>
    %90 = arith.addf %88, %89 : vector<8x16x128xf32>
    %cst_55 = arith.constant 0.000000e+00 : f32
    %91 = vector.broadcast %cst_55 : f32 to vector<8x16x128xf32>
    %92 = arith.maximumf %90, %91 : vector<8x16x128xf32>
    %c0_56 = arith.constant 0 : index
    %c2_57 = arith.constant 2 : index
    %c0_58 = arith.constant 0 : index
    %93 = vector.load %arg10[%c0_56, %c2_57, %c0_58] : memref<8x20x128xf32, #tpu.memory_space<vmem>>, vector<8x16x128xf32>
    tpu.vector_store %arg10[%c0_56, %c2_57, %c0_58], %92 {strides = array<i32>} : memref<8x20x128xf32, #tpu.memory_space<vmem>>, vector<8x16x128xf32>,
    %c0_59 = arith.constant 0 : index
    %c1_60 = arith.constant 1 : index
    %c0_61 = arith.constant 0 : index
    %94 = vector.load %arg10[%c0_59, %c1_60, %c0_61] : memref<8x20x128xf32, #tpu.memory_space<vmem>>, vector<8x16x128xf32>
    %95 = vector.shape_cast %94 : vector<8x16x128xf32> to vector<128x128xf32>
    %c0_62 = arith.constant 0 : index
    %c0_63 = arith.constant 0 : index
    %c0_64 = arith.constant 0 : index
    %96 = vector.load %arg4[%c0_62, %c0_63, %c0_64] : memref<3x128x128xf32, #tpu.memory_space<vmem>>, vector<1x128x128xf32>
    %97 = vector.shape_cast %96 : vector<1x128x128xf32> to vector<128x128xf32>
    %cst_65 = arith.constant dense<0.000000e+00> : vector<128x128xf32>
    %98 = tpu.matmul %95, %97, %cst_65 {dimension_numbers = #tpu.dot_dimension_numbers<[1], [0], [0], [1], [0, 0, 1, 1], [], []>} : vector<128x128xf32>, vector<128x128xf32>, vector<128x128xf32> -> vector<128x128xf32>
    %c0_66 = arith.constant 0 : index
    %c2_67 = arith.constant 2 : index
    %c0_68 = arith.constant 0 : index
    %99 = vector.load %arg10[%c0_66, %c2_67, %c0_68] : memref<8x20x128xf32, #tpu.memory_space<vmem>>, vector<8x16x128xf32>
    %100 = vector.shape_cast %99 : vector<8x16x128xf32> to vector<128x128xf32>
    %c1_69 = arith.constant 1 : index
    %c0_70 = arith.constant 0 : index
    %c0_71 = arith.constant 0 : index
    %101 = vector.load %arg4[%c1_69, %c0_70, %c0_71] : memref<3x128x128xf32, #tpu.memory_space<vmem>>, vector<1x128x128xf32>
    %102 = vector.shape_cast %101 : vector<1x128x128xf32> to vector<128x128xf32>
    %cst_72 = arith.constant dense<0.000000e+00> : vector<128x128xf32>
    %103 = tpu.matmul %100, %102, %cst_72 {dimension_numbers = #tpu.dot_dimension_numbers<[1], [0], [0], [1], [0, 0, 1, 1], [], []>} : vector<128x128xf32>, vector<128x128xf32>, vector<128x128xf32> -> vector<128x128xf32>
    %104 = arith.addf %98, %103 : vector<128x128xf32>
    %c0_73 = arith.constant 0 : index
    %c3_74 = arith.constant 3 : index
    %c0_75 = arith.constant 0 : index
    %105 = vector.load %arg10[%c0_73, %c3_74, %c0_75] : memref<8x20x128xf32, #tpu.memory_space<vmem>>, vector<8x16x128xf32>
    %106 = vector.shape_cast %105 : vector<8x16x128xf32> to vector<128x128xf32>
    %c2_76 = arith.constant 2 : index
    %c0_77 = arith.constant 0 : index
    %c0_78 = arith.constant 0 : index
    %107 = vector.load %arg4[%c2_76, %c0_77, %c0_78] : memref<3x128x128xf32, #tpu.memory_space<vmem>>, vector<1x128x128xf32>
    %108 = vector.shape_cast %107 : vector<1x128x128xf32> to vector<128x128xf32>
    %cst_79 = arith.constant dense<0.000000e+00> : vector<128x128xf32>
    %109 = tpu.matmul %106, %108, %cst_79 {dimension_numbers = #tpu.dot_dimension_numbers<[1], [0], [0], [1], [0, 0, 1, 1], [], []>} : vector<128x128xf32>, vector<128x128xf32>, vector<128x128xf32> -> vector<128x128xf32>
    %110 = arith.addf %104, %109 : vector<128x128xf32>
    %111 = vector.shape_cast %110 : vector<128x128xf32> to vector<8x16x128xf32>
    %112 = vector.extract_strided_slice %0 {offsets = [2, 0], sizes = [1, 128], strides = [1, 1]} : vector<8x128xf32> to vector<1x128xf32>
    %113 = vector.shape_cast %112 : vector<1x128xf32> to vector<1x1x128xf32>
    %114 = vector.extract_strided_slice %0 {offsets = [6, 0], sizes = [1, 128], strides = [1, 1]} : vector<8x128xf32> to vector<1x128xf32>
    %115 = vector.shape_cast %114 : vector<1x128xf32> to vector<1x1x128xf32>
    %cst_80 = arith.constant dense<0.000000e+00> : vector<128xf32>
    %116 = vector.multi_reduction <add>, %111, %cst_80 [0, 1] : vector<8x16x128xf32> to vector<128xf32>
    %117 = vector.shape_cast %116 : vector<128xf32> to vector<1x1x128xf32>
    %cst_81 = arith.constant 7.812500e-03 : f32
    %118 = vector.broadcast %cst_81 : f32 to vector<1x1x128xf32>
    %119 = arith.mulf %117, %118 : vector<1x1x128xf32>
    %120 = arith.mulf %111, %111 : vector<8x16x128xf32>
    %cst_82 = arith.constant dense<0.000000e+00> : vector<128xf32>
    %121 = vector.multi_reduction <add>, %120, %cst_82 [0, 1] : vector<8x16x128xf32> to vector<128xf32>
    %122 = vector.shape_cast %121 : vector<128xf32> to vector<1x1x128xf32>
    %cst_83 = arith.constant 7.812500e-03 : f32
    %123 = vector.broadcast %cst_83 : f32 to vector<1x1x128xf32>
    %124 = arith.mulf %122, %123 : vector<1x1x128xf32>
    %125 = arith.mulf %119, %119 : vector<1x1x128xf32>
    %126 = arith.subf %124, %125 : vector<1x1x128xf32>
    %cst_84 = arith.constant 9.99999974E-6 : f32
    %127 = vector.broadcast %cst_84 : f32 to vector<1x1x128xf32>
    %128 = arith.addf %126, %127 : vector<1x1x128xf32>
    %129 = math.rsqrt %128 : vector<1x1x128xf32>
    %130 = arith.mulf %113, %129 : vector<1x1x128xf32>
    %131 = arith.mulf %119, %130 : vector<1x1x128xf32>
    %132 = arith.subf %115, %131 : vector<1x1x128xf32>
    %133 = vector.broadcast %130 : vector<1x1x128xf32> to vector<8x16x128xf32>
    %134 = arith.mulf %111, %133 : vector<8x16x128xf32>
    %135 = vector.broadcast %132 : vector<1x1x128xf32> to vector<8x16x128xf32>
    %136 = arith.addf %134, %135 : vector<8x16x128xf32>
    %137 = vector.extract_strided_slice %1 {offsets = [0, 0, 0], sizes = [8, 16, 4], strides = [1, 1, 1]} : vector<8x16x28xf32> to vector<8x16x4xf32>
    %138 = vector.shape_cast %137 : vector<8x16x4xf32> to vector<128x4xf32>
    %c0_85 = arith.constant 0 : index
    %c0_86 = arith.constant 0 : index
    %139 = vector.load %arg5[%c0_85, %c0_86] : memref<4x128xf32, #tpu.memory_space<vmem>>, vector<4x128xf32>
    %cst_87 = arith.constant dense<0.000000e+00> : vector<128x128xf32>
    %140 = tpu.matmul %138, %139, %cst_87 {dimension_numbers = #tpu.dot_dimension_numbers<[1], [0], [0], [1], [0, 0, 1, 1], [], []>} : vector<128x4xf32>, vector<4x128xf32>, vector<128x128xf32> -> vector<128x128xf32>
    %141 = vector.shape_cast %140 : vector<128x128xf32> to vector<8x16x128xf32>
    %142 = vector.extract_strided_slice %0 {offsets = [3, 0], sizes = [1, 128], strides = [1, 1]} : vector<8x128xf32> to vector<1x128xf32>
    %143 = vector.shape_cast %142 : vector<1x128xf32> to vector<1x1x128xf32>
    %144 = vector.extract_strided_slice %0 {offsets = [7, 0], sizes = [1, 128], strides = [1, 1]} : vector<8x128xf32> to vector<1x128xf32>
    %145 = vector.shape_cast %144 : vector<1x128xf32> to vector<1x1x128xf32>
    %cst_88 = arith.constant dense<0.000000e+00> : vector<128xf32>
    %146 = vector.multi_reduction <add>, %141, %cst_88 [0, 1] : vector<8x16x128xf32> to vector<128xf32>
    %147 = vector.shape_cast %146 : vector<128xf32> to vector<1x1x128xf32>
    %cst_89 = arith.constant 7.812500e-03 : f32
    %148 = vector.broadcast %cst_89 : f32 to vector<1x1x128xf32>
    %149 = arith.mulf %147, %148 : vector<1x1x128xf32>
    %150 = arith.mulf %141, %141 : vector<8x16x128xf32>
    %cst_90 = arith.constant dense<0.000000e+00> : vector<128xf32>
    %151 = vector.multi_reduction <add>, %150, %cst_90 [0, 1] : vector<8x16x128xf32> to vector<128xf32>
    %152 = vector.shape_cast %151 : vector<128xf32> to vector<1x1x128xf32>
    %cst_91 = arith.constant 7.812500e-03 : f32
    %153 = vector.broadcast %cst_91 : f32 to vector<1x1x128xf32>
    %154 = arith.mulf %152, %153 : vector<1x1x128xf32>
    %155 = arith.mulf %149, %149 : vector<1x1x128xf32>
    %156 = arith.subf %154, %155 : vector<1x1x128xf32>
    %cst_92 = arith.constant 9.99999974E-6 : f32
    %157 = vector.broadcast %cst_92 : f32 to vector<1x1x128xf32>
    %158 = arith.addf %156, %157 : vector<1x1x128xf32>
    %159 = math.rsqrt %158 : vector<1x1x128xf32>
    %160 = arith.mulf %143, %159 : vector<1x1x128xf32>
    %161 = arith.mulf %149, %160 : vector<1x1x128xf32>
    %162 = arith.subf %145, %161 : vector<1x1x128xf32>
    %163 = vector.broadcast %160 : vector<1x1x128xf32> to vector<8x16x128xf32>
    %164 = arith.mulf %141, %163 : vector<8x16x128xf32>
    %165 = vector.broadcast %162 : vector<1x1x128xf32> to vector<8x16x128xf32>
    %166 = arith.addf %164, %165 : vector<8x16x128xf32>
    %167 = arith.addf %136, %166 : vector<8x16x128xf32>
    %cst_93 = arith.constant 0.000000e+00 : f32
    %168 = vector.broadcast %cst_93 : f32 to vector<8x16x128xf32>
    %169 = arith.maximumf %167, %168 : vector<8x16x128xf32>
    %cst_94 = arith.constant dense<0.000000e+00> : vector<8x128xf32>
    %170 = vector.multi_reduction <add>, %169, %cst_94 [1] : vector<8x16x128xf32> to vector<8x128xf32>
    %cst_95 = arith.constant 6.250000e-02 : f32
    %171 = vector.broadcast %cst_95 : f32 to vector<8x128xf32>
    %172 = arith.mulf %170, %171 : vector<8x128xf32>
    %c0_96 = arith.constant 0 : index
    %c0_97 = arith.constant 0 : index
    %173 = vector.load %arg1[%c0_96, %c0_97] : memref<8x8xf32, #tpu.memory_space<vmem>>, vector<8x8xf32>
    %cst_98 = arith.constant dense<0.000000e+00> : vector<8xf32>
    %174 = vector.multi_reduction <add>, %173, %cst_98 [0] : vector<8x8xf32> to vector<8xf32>
    %175 = vector.shape_cast %174 : vector<8xf32> to vector<1x8xf32>
    %cst_99 = arith.constant 1.250000e-01 : f32
    %176 = vector.broadcast %cst_99 : f32 to vector<1x8xf32>
    %177 = arith.mulf %175, %176 : vector<1x8xf32>
    %cst_100 = arith.constant dense<0.000000e+00> : vector<1x128xf32>
    %178 = tpu.matmul %177, %172, %cst_100 {dimension_numbers = #tpu.dot_dimension_numbers<[1], [0], [0], [1], [0, 0, 1, 1], [], []>} : vector<1x8xf32>, vector<8x128xf32>, vector<1x128xf32> -> vector<1x128xf32>
    %c0_101 = arith.constant 0 : index
    %c0_102 = arith.constant 0 : index
    %179 = vector.load %arg7[%c0_101, %c0_102] : memref<128x128xf32, #tpu.memory_space<vmem>>, vector<128x128xf32>
    %cst_103 = arith.constant dense<0.000000e+00> : vector<1x128xf32>
    %180 = tpu.matmul %178, %179, %cst_103 {dimension_numbers = #tpu.dot_dimension_numbers<[1], [0], [0], [1], [0, 0, 1, 1], [], []>} : vector<1x128xf32>, vector<128x128xf32>, vector<1x128xf32> -> vector<1x128xf32>
    %c0_104 = arith.constant 0 : index
    %c0_105 = arith.constant 0 : index
    %181 = vector.load %arg8[%c0_104, %c0_105] : memref<1x128xf32, #tpu.memory_space<vmem>>, vector<1x128xf32>
    %182 = arith.addf %180, %181 : vector<1x128xf32>
    %c0_106 = arith.constant 0 : index
    %c0_107 = arith.constant 0 : index
    %183 = vector.load %arg9[%c0_106, %c0_107] : memref<1x128xf32, #tpu.memory_space<vmem>>, vector<1x128xf32>
    tpu.vector_store %arg9[%c0_106, %c0_107], %182 {strides = array<i32>} : memref<1x128xf32, #tpu.memory_space<vmem>>, vector<1x128xf32>,
    return
  }
}

</mosaic_0001>

<bundles_post_ra>
// kernel: tpu_custom_call.1
= control target key start
LH: loop header
LB: loop body
LE: loop exit
PB: predicated region body
PF: predicated region fallthrough
CT: control target
= control target key end

     0   :  { %14 = vsyncpa [#allocation4], 0  ;;  %s5119_s0 = inlined_call_operand.hbm [shape: f32[8,16,28], index: 0, kind: input, shape index: {}]   ;;  %s5120_s1 = inlined_call_operand.hbm [shape: f32[8,8], index: 1, kind: input, shape index: {}]   ;;  %s5121_s2 = inlined_call_operand.hbm [shape: f32[28,128], index: 2, kind: input, shape index: {}]   ;;  %s5122_s3 = inlined_call_operand.hbm [shape: f32[5,128,128], index: 3, kind: input, shape index: {}]   ;;  %s5123_s4 = inlined_call_operand.hbm [shape: f32[3,128,128], index: 4, kind: input, shape index: {}]   ;;  %s5124_s5 = inlined_call_operand.vmem [shape: f32[4,128], index: 5, kind: input, shape index: {}]   ;;  %s5125_s6 = inlined_call_operand.vmem [shape: f32[8,128], index: 6, kind: input, shape index: {}]   ;;  %s5126_s7 = inlined_call_operand.hbm [shape: f32[128,128], index: 7, kind: input, shape index: {}]   ;;  %s5127_s8 = inlined_call_operand.vmem [shape: f32[1,128], index: 8, kind: input, shape index: {}]   ;;  %s5128_s9 = inlined_call_operand.hbm [shape: f32[1,128], index: 9, kind: output, shape index: {}]  }
   0x1   :  { %15 = vsyncpa [#allocation7], 0 }
   0x2   :  { %16 = vsyncpa [#allocation10], 0 }
   0x3   :  { %17 = vsyncpa [#allocation13], 0 }
   0x4   :  { %18 = vsyncpa [#allocation5], 0  ;;  %s4317_s30 = smov [#allocation6]   ;;  %s4153_s13 = scalar_lea.hbm %s5120_s1, 128 }
   0x5   :  { %s37_s10 = sshll.u32 %s4317_s30, 4  ;;  %p4154_p0 = scmp.ne.s32.totalorder %s5120_s1, %s4153_s13  ;;  %s38_s10 = int_to_ptr.vmem [resolvable:$true] %s37_s10 }
   0x6   :  { %p4157_p1 = scmp.lt.u32.totalorder %s4153_s13, %s5120_s1 }
   0x8   :  { %p4159_p2 = pnand %p4157_p1, %p4154_p0 }
   0xa   :  { %4162 = shalt.err (!%p4159_p2)
}
   0xb   :  { %s4163_s18 = scalar_lea.vmem %s38_s10, 128  ;;  %p4168_p4 = scmp.lt.s32.totalorder %s38_s10, %s38_s10 }
   0xc   :  { %p4164_p3 = scmp.ne.s32.totalorder %s38_s10, %s4163_s18  ;;  %p4169_p5 = scmp.lt.s32.totalorder %s4163_s18, %s4163_s18 }
   0xe   :  { %p4170_p6 = por %p4169_p5, %p4168_p4 }
  0x10   :  { %p4171_p7 = pnand %p4170_p6, %p4164_p3 }
  0x12   :  { %4174 = shalt.err (!%p4171_p7)
}
  0x13   :  { %40 = dma.hbm_to_vmem [thread:$0]  %s5120_s1, 128, %s38_s10, [#allocation7]  }
  0x14   :  { %s4318_s21 = smov [#allocation9]   ;;  %s4319_s23 = smov [#allocation3]  }
  0x15   :  { %s58_s22 = sshll.u32 %s4318_s21, 4  ;;  %s24_s24 = sshll.u32 %s4319_s23, 4  ;;  %s59_s22 = int_to_ptr.vmem [resolvable:$true] %s58_s22  ;;  %s25_s24 = int_to_ptr.vmem [resolvable:$true] %s24_s24 }
  0x16   :  { %s4175_s27 = scalar_lea.hbm %s5122_s3, 10240 }
  0x17   :  { %p4176_p8 = scmp.ne.s32.totalorder %s5122_s3, %s4175_s27  ;;  %p4179_p9 = scmp.lt.u32.totalorder %s4175_s27, %s5122_s3 }
  0x19   :  { %p4181_p10 = pnand %p4179_p9, %p4176_p8 }
  0x1b   :  { %4184 = shalt.err (!%p4181_p10)
}
  0x1c   :  { %s4185_s1 = scalar_lea.vmem %s59_s22, 10240  ;;  %p4190_p12 = scmp.lt.s32.totalorder %s59_s22, %s59_s22 }
  0x1d   :  { %p4186_p11 = scmp.ne.s32.totalorder %s59_s22, %s4185_s1  ;;  %p4191_p13 = scmp.lt.s32.totalorder %s4185_s1, %s4185_s1 }
  0x1f   :  { %p4192_p0 = por %p4191_p13, %p4190_p12 }
  0x21   :  { %p4193_p1 = pnand %p4192_p0, %p4186_p11 }
  0x23   :  { %4196 = shalt.err (!%p4193_p1)
}
  0x24   :  { %s4320_s10 = smov 128   ;;  %s4321_s12 = smov 8  }
  0x25   :  { %64 = dma.hbm_to_vmem [thread:$0]  %s5122_s3, 10240, %s59_s22, [#allocation10], %s4320_s10, %s4320_s10, %s4321_s12  }
  0x26   :  { %s4197_s17 = scalar_lea.hbm %s5119_s0, 2048 }
  0x27   :  { %p4198_p2 = scmp.ne.s32.totalorder %s5119_s0, %s4197_s17  ;;  %p4201_p3 = scmp.lt.u32.totalorder %s4197_s17, %s5119_s0 }
  0x29   :  { %p4203_p4 = pnand %p4201_p3, %p4198_p2 }
  0x2b   :  { %4206 = shalt.err (!%p4203_p4)
}
  0x2c   :  { %s4207_s23 = scalar_lea.vmem %s25_s24, 2048  ;;  %p4212_p6 = scmp.lt.s32.totalorder %s25_s24, %s25_s24 }
  0x2d   :  { %p4208_p5 = scmp.ne.s32.totalorder %s25_s24, %s4207_s23  ;;  %p4213_p7 = scmp.lt.s32.totalorder %s4207_s23, %s4207_s23 }
  0x2f   :  { %p4214_p8 = por %p4213_p7, %p4212_p6 }
  0x31   :  { %p4215_p9 = pnand %p4214_p8, %p4208_p5 }
  0x33   :  { %4218 = shalt.err (!%p4215_p9)
}
  0x34   :  { %30 = dma.hbm_to_vmem [thread:$0]  %s5119_s0, 2048, %s25_s24, [#allocation4], %s4320_s10, %s4320_s10, %s4321_s12  }
  0x35   :  { %s4322_s25 = smov [#allocation8]   ;;  %s4323_s27 = smov [#allocation11]  }
  0x36   :  { %s46_s26 = sshll.u32 %s4322_s25, 4  ;;  %s70_s28 = sshll.u32 %s4323_s27, 4  ;;  %s47_s26 = int_to_ptr.vmem [resolvable:$true] %s46_s26  ;;  %s71_s28 = int_to_ptr.vmem [resolvable:$true] %s70_s28 }
  0x37   :  { %s4219_s11 = scalar_lea.hbm %s5121_s2, 512 }
  0x38   :  { %p4220_p10 = scmp.ne.s32.totalorder %s5121_s2, %s4219_s11  ;;  %p4223_p11 = scmp.lt.u32.totalorder %s4219_s11, %s5121_s2 }
  0x3a   :  { %p4225_p12 = pnand %p4223_p11, %p4220_p10 }
  0x3c   :  { %4228 = shalt.err (!%p4225_p12)
}
  0x3d   :  { %s4229_s0 = scalar_lea.vmem %s47_s26, 512  ;;  %p4234_p0 = scmp.lt.s32.totalorder %s47_s26, %s47_s26 }
  0x3e   :  { %p4230_p13 = scmp.ne.s32.totalorder %s47_s26, %s4229_s0  ;;  %p4235_p1 = scmp.lt.s32.totalorder %s4229_s0, %s4229_s0 }
  0x40   :  { %p4236_p2 = por %p4235_p1, %p4234_p0 }
  0x42   :  { %p4237_p3 = pnand %p4236_p2, %p4230_p13 }
  0x44   :  { %4240 = shalt.err (!%p4237_p3)
}
  0x45   :  { %52 = dma.hbm_to_vmem [thread:$0]  %s5121_s2, 512, %s47_s26, [#allocation7], %s4320_s10, %s4320_s10, %s4321_s12  }
  0x46   :  { %s4241_s19 = scalar_lea.hbm %s5123_s4, 6144 }
  0x47   :  { %p4242_p4 = scmp.ne.s32.totalorder %s5123_s4, %s4241_s19  ;;  %p4245_p5 = scmp.lt.u32.totalorder %s4241_s19, %s5123_s4 }
  0x49   :  { %p4247_p6 = pnand %p4245_p5, %p4242_p4 }
  0x4b   :  { %4250 = shalt.err (!%p4247_p6)
}
  0x4c   :  { %s4251_s22 = scalar_lea.vmem %s71_s28, 6144  ;;  %p4256_p8 = scmp.lt.s32.totalorder %s71_s28, %s71_s28 }
  0x4d   :  { %p4252_p7 = scmp.ne.s32.totalorder %s71_s28, %s4251_s22  ;;  %p4257_p9 = scmp.lt.s32.totalorder %s4251_s22, %s4251_s22 }
  0x4f   :  { %p4258_p10 = por %p4257_p9, %p4256_p8 }
  0x51   :  { %p4259_p11 = pnand %p4258_p10, %p4252_p7 }
  0x53   :  { %4262 = shalt.err (!%p4259_p11)
}
  0x54   :  { %76 = dma.hbm_to_vmem [thread:$0]  %s5123_s4, 6144, %s71_s28, [#allocation10], %s4320_s10, %s4320_s10, %s4321_s12  }
  0x55   :  { %s4324_s26 = smov [#allocation12]   ;;  %s4263_s11 = scalar_lea.hbm %s5126_s7, 2048 }
  0x56   :  { %s86_s27 = sshll.u32 %s4324_s26, 4  ;;  %p4264_p12 = scmp.ne.s32.totalorder %s5126_s7, %s4263_s11  ;;  %s87_s27 = int_to_ptr.vmem [resolvable:$true] %s86_s27 }
  0x57   :  { %p4267_p13 = scmp.lt.u32.totalorder %s4263_s11, %s5126_s7 }
  0x59   :  { %p4269_p0 = pnand %p4267_p13, %p4264_p12 }
  0x5b   :  { %4272 = shalt.err (!%p4269_p0)
}
  0x5c   :  { %s4273_s0 = scalar_lea.vmem %s87_s27, 2048  ;;  %p4278_p2 = scmp.lt.s32.totalorder %s87_s27, %s87_s27 }
  0x5d   :  { %p4274_p1 = scmp.ne.s32.totalorder %s87_s27, %s4273_s0  ;;  %p4279_p3 = scmp.lt.s32.totalorder %s4273_s0, %s4273_s0 }
  0x5f   :  { %p4280_p4 = por %p4279_p3, %p4278_p2 }
  0x61   :  { %p4281_p5 = pnand %p4280_p4, %p4274_p1 }
  0x63   :  { %4284 = shalt.err (!%p4281_p5)
}
  0x64   :  { %92 = dma.hbm_to_vmem [thread:$0]  %s5126_s7, 2048, %s87_s27, [#allocation13], %s4320_s10, %s4320_s10, %s4321_s12  }
  0x65   :  { %4307 = dma.done.wait [#allocation4], 2048  }
  0x66   :  { %4308 = vsyncadd [#allocation4], 4294965248 }
  0x67   :  { %4309 = dma.done.wait [#allocation7], 640  }
  0x68   :  { %4310 = vsyncadd [#allocation7], 4294966656 }
  0x69   :  { %4311 = dma.done.wait [#allocation10], 16384  }
  0x6a   :  { %4312 = vsyncadd [#allocation10], 4294950912 }
  0x6b   :  { %4313 = dma.done.wait [#allocation13], 2048  }
  0x6c   :  { %4314 = vsyncadd [#allocation13], 4294965248  ;;  %vm183_vm0 = vcmask 1043456   ;;  %vm134_vm1 = vcmask 228352   ;;  %v130_v0 = vld [vmem:[#allocation8] sm:$0xff]  ;;  %v131_v1 = vld [vmem:[#allocation8 + $0x8] sm:$0xff] }
  0x6d   :  { %v132_v2 = vld [vmem:[#allocation8 + $0x10] sm:$0xff]  ;;  %v3729_v3 = vpack.c.bf16 %v131_v1, %v130_v0  ;;  %v133_v4 = vld [vmem:[#allocation8 + $0x18] sm:$0xf]  ;;  %vm4325_vm2 = vmmov 1   ;;  %v115_v7 = vld [vmem:[#allocation3 + $0x8] sm:$0xff]  ;;  %v4326_v42 = vmov 0.0  }
  0x6e   :  { %v114_v5 = vld [vmem:[#allocation3] sm:$0xff]  ;;  %v3733_v6 = vpack.c.bf16 %v133_v4, %v132_v2  ;;  %vm3734_vm3 = vmpackc.low %vm183_vm0, %vm4325_vm2  ;;  %v116_v8 = vld [vmem:[#allocation3 + $0x10] sm:$0xff]  ;;  %479 = vst [vmem:[#allocation2 + $0xa8] sm:$0xff] %v4326_v42  ;;  %vm2237_vm4 = vcmask 31744   ;;  %vm4327_vm5 = vmmov 0   ;;  %vm2625_vm6 = vcmask 64512  }
  0x6f   :  { %3191 = vmatprep.mubr.msk.f32.mxu0 %vm134_vm1, %v114_v5  ;;  %3730 = vmatprep.subr.bf16.mxu0 %v3729_v3  ;;  %v117_v9 = vld [vmem:[#allocation3 + $0x18] sm:$0xff]  ;;  %v118_v10 = vld [vmem:[#allocation3 + $0x20] sm:$0xff]  ;;  %v119_v11 = vld [vmem:[#allocation3 + $0x28] sm:$0xff]  ;;  %480 = vst [vmem:[#allocation2 + $0xb0] sm:$0xff] %v4326_v42  ;;  %vm2642_vm7 = vcmask 1041409   ;;  %vm2644_vm8 = vcmask 1042434  }
  0x70   :  { %3732 = vmatpush3.bf16.msra.mxu0 %v3729_v3  ;;  %v120_v12 = vld [vmem:[#allocation3 + $0x30] sm:$0xff]  ;;  %v121_v13 = vld [vmem:[#allocation3 + $0x38] sm:$0xff]  ;;  %v122_v14 = vld [vmem:[#allocation3 + $0x40] sm:$0xff]  ;;  %481 = vst [vmem:[#allocation2 + $0xb8] sm:$0xf] %v4326_v42  ;;  %vm2646_vm9 = vcmask 1043459  }
  0x71   :  { %3735 = vmatprep.subr.msk.bf16.mxu0 %vm3734_vm3, %v3733_v6  ;;  %v123_v15 = vld [vmem:[#allocation3 + $0x48] sm:$0xff]  ;;  %v124_v16 = vld [vmem:[#allocation3 + $0x50] sm:$0xff]  ;;  %v125_v17 = vld [vmem:[#allocation3 + $0x58] sm:$0xff]  ;;  %458 = vst [vmem:[#allocation2] sm:$0xff] %v4326_v42  ;;  %vm2648_vm10 = vcmask 1044484   ;;  %vm2650_vm11 = vcmask 1045509  }
  0x72   :  { %v126_v18 = vld [vmem:[#allocation3 + $0x60] sm:$0xff]  ;;  %v127_v19 = vld [vmem:[#allocation3 + $0x68] sm:$0xff]  ;;  %v128_v20 = vld [vmem:[#allocation3 + $0x70] sm:$0xff]  ;;  %459 = vst [vmem:[#allocation2 + $0x8] sm:$0xff] %v4326_v42  ;;  %vm2652_vm12 = vcmask 1046534   ;;  %vm2654_vm13 = vcmask 1047559  }
  0x73   :  { %v129_v21 = vld [vmem:[#allocation3 + $0x78] sm:$0xff]  ;;  %v547_v22 = vld [vmem:[#allocation9 + $0x80] sm:$0xff]  ;;  %v548_v23 = vld [vmem:[#allocation9 + $0x88] sm:$0xff]  ;;  %460 = vst [vmem:[#allocation2 + $0x10] sm:$0xf] %v4326_v42  ;;  %s4329_s18 = smov [#allocation14]  }
  0x74   :  { %3738 = vmatpush3.bf16.msk.msra.mxu0 %vm3734_vm3, %v3733_v6  ;;  %v3739_v24 = vpack.c.bf16 %v548_v23, %v547_v22  ;;  %v549_v25 = vld [vmem:[#allocation9 + $0x90] sm:$0xff]  ;;  %v550_v26 = vld [vmem:[#allocation9 + $0x98] sm:$0xff]  ;;  %v551_v28 = vld [vmem:[#allocation9 + $0xa0] sm:$0xff]  ;;  %461 = vst [vmem:[#allocation2 + $0x18] sm:$0xff] %v4326_v42  ;;  %s2824_s19 = sshll.u32 %s4329_s18, 4  ;;  %s2825_s19 = int_to_ptr.vmem [resolvable:$true] %s2824_s19 }
  0x75   :  { %v3743_v27 = vpack.c.bf16 %v550_v26, %v549_v25  ;;  %v552_v29 = vld [vmem:[#allocation9 + $0xa8] sm:$0xff]  ;;  %v553_v31 = vld [vmem:[#allocation9 + $0xb0] sm:$0xff]  ;;  %v554_v32 = vld [vmem:[#allocation9 + $0xb8] sm:$0xff]  ;;  %462 = vst [vmem:[#allocation2 + $0x20] sm:$0xff] %v4326_v42  ;;  %s4285_s20 = scalar_lea.vmem %s2825_s19, 16  ;;  %s4289_s21 = scalar_lea.vmem %s2825_s19, 32 }
  0x76   :  { %3740 = vmatprep.subr.bf16.mxu1 %v3739_v24  ;;  %v3747_v30 = vpack.c.bf16 %v552_v29, %v551_v28  ;;  %v3751_v33 = vpack.c.bf16 %v554_v32, %v553_v31  ;;  %v555_v34 = vld [vmem:[#allocation9 + $0xc0] sm:$0xff]  ;;  %v556_v35 = vld [vmem:[#allocation9 + $0xc8] sm:$0xff]  ;;  %v557_v37 = vld [vmem:[#allocation9 + $0xd0] sm:$0xff]  ;;  %463 = vst [vmem:[#allocation2 + $0x28] sm:$0xf] %v4326_v42  ;;  %p4286_p6 = scmp.ne.s32.totalorder %s2825_s19, %s4285_s20  ;;  %p4290_p7 = scmp.lt.s32.totalorder %s2825_s19, %s2825_s19 }
  0x77   :  { %3192 = vmatmul.mubr.msk.f32.vlgmr.msra.gmra.mrb[0].mxu0 %vm134_vm1, %v115_v7  ;;  %3742 = vmatpush3.bf16.msra.mxu1 %v3739_v24  ;;  %v3755_v36 = vpack.c.bf16 %v556_v35, %v555_v34  ;;  %v558_v38 = vld [vmem:[#allocation9 + $0xd8] sm:$0xff]  ;;  %v559_v40 = vld [vmem:[#allocation9 + $0xe0] sm:$0xff]  ;;  %v560_v41 = vld [vmem:[#allocation9 + $0xe8] sm:$0xff]  ;;  %464 = vst [vmem:[#allocation2 + $0x30] sm:$0xff] %v4326_v42  ;;  %p4291_p8 = scmp.lt.s32.totalorder %s4289_s21, %s4285_s20 }
  0x78   :  { %3194 = vmatprep.mubr.msk.f32.mxu0 %vm134_vm1, %v116_v8  ;;  %3744 = vmatprep.subr.bf16.mxu1 %v3743_v27  ;;  %v3759_v39 = vpack.c.bf16 %v558_v38, %v557_v37  ;;  %465 = vst [vmem:[#allocation2 + $0x38] sm:$0xff] %v4326_v42  ;;  %466 = vst [vmem:[#allocation2 + $0x40] sm:$0xf] %v4326_v42  ;;  %v3763_v43 = vpack.c.bf16 %v560_v41, %v559_v40  ;;  %v561_v44 = vld [vmem:[#allocation9 + $0xf0] sm:$0xff]  ;;  %v562_v45 = vld [vmem:[#allocation9 + $0xf8] sm:$0xff] }
  0x79   :  { %467 = vst [vmem:[#allocation2 + $0x48] sm:$0xff] %v4326_v42  ;;  %468 = vst [vmem:[#allocation2 + $0x50] sm:$0xff] %v4326_v42  ;;  %v3767_v46 = vpack.c.bf16 %v562_v45, %v561_v44  ;;  %v514_v47 = vld [vmem:[#allocation9] sm:$0xff]  ;;  %v515_v48 = vld [vmem:[#allocation9 + $0x8] sm:$0xff]  ;;  %p4292_p9 = por %p4291_p8, %p4290_p7 }
  0x7a   :  { %469 = vst [vmem:[#allocation2 + $0x58] sm:$0xf] %v4326_v42  ;;  %470 = vst [vmem:[#allocation2 + $0x60] sm:$0xff] %v4326_v42  ;;  %v4508_v49 = vpack.c.bf16 %v515_v48, %v514_v47 }
  0x7b   :  { %3195 = vmatmul.mubr.msk.f32.gmra.mrb[2].mxu0 %vm134_vm1, %v117_v9  ;;  %3746 = vmatpush3.bf16.msra.mxu1 %v3743_v27  ;;  %471 = vst [vmem:[#allocation2 + $0x68] sm:$0xff] %v4326_v42  ;;  %472 = vst [vmem:[#allocation2 + $0x70] sm:$0xf] %v4326_v42  ;;  %p4293_p10 = pnand %p4292_p9, %p4286_p6 }
  0x7c   :  { %3197 = vmatprep.mubr.msk.f32.mxu0 %vm134_vm1, %v118_v10  ;;  %3748 = vmatprep.subr.bf16.mxu1 %v3747_v30  ;;  %473 = vst [vmem:[#allocation2 + $0x78] sm:$0xff] %v4326_v42  ;;  %474 = vst [vmem:[#allocation2 + $0x80] sm:$0xff] %v4326_v42 }
  0x7d   :  { %475 = vst [vmem:[#allocation2 + $0x88] sm:$0xf] %v4326_v42  ;;  %476 = vst [vmem:[#allocation2 + $0x90] sm:$0xff] %v4326_v42 }
  0x7e   :  { %477 = vst [vmem:[#allocation2 + $0x98] sm:$0xff] %v4326_v42  ;;  %478 = vst [vmem:[#allocation2 + $0xa0] sm:$0xf] %v4326_v42 }
  0x7f   :  { %3198 = vmatmul.mubr.msk.f32.gmra.mrb[4].mxu0 %vm134_vm1, %v119_v11  ;;  %3750 = vmatpush3.bf16.msra.mxu1 %v3747_v30 }
  0x80   :  { %3200 = vmatprep.mubr.msk.f32.mxu0 %vm134_vm1, %v120_v12  ;;  %3752 = vmatprep.subr.bf16.mxu1 %v3751_v33 }
  0x83   :  { %3201 = vmatmul.mubr.msk.f32.gmra.mrb[6].mxu0 %vm134_vm1, %v121_v13  ;;  %3754 = vmatpush3.bf16.msra.mxu1 %v3751_v33 }
  0x84   :  { %3203 = vmatprep.mubr.msk.f32.mxu0 %vm134_vm1, %v122_v14  ;;  %3756 = vmatprep.subr.bf16.mxu1 %v3755_v36 }
  0x87   :  { %3204 = vmatmul.mubr.msk.f32.gmra.mrb[8].mxu0 %vm134_vm1, %v123_v15  ;;  %3758 = vmatpush3.bf16.msra.mxu1 %v3755_v36 }
  0x88   :  { %3206 = vmatprep.mubr.msk.f32.mxu0 %vm134_vm1, %v124_v16  ;;  %3760 = vmatprep.subr.bf16.mxu1 %v3759_v39 }
  0x8b   :  { %3207 = vmatmul.mubr.msk.f32.gmra.mrb[10].mxu0 %vm134_vm1, %v125_v17  ;;  %3762 = vmatpush3.bf16.msra.mxu1 %v3759_v39 }
  0x8c   :  { %3209 = vmatprep.mubr.msk.f32.mxu0 %vm134_vm1, %v126_v18  ;;  %3764 = vmatprep.subr.bf16.mxu1 %v3763_v43 }
  0x8f   :  { %3210 = vmatmul.mubr.msk.f32.gmra.mrb[12].mxu0 %vm134_vm1, %v127_v19  ;;  %3766 = vmatpush3.bf16.msra.mxu1 %v3763_v43 }
  0x90   :  { %3212 = vmatprep.mubr.msk.f32.mxu0 %vm134_vm1, %v128_v20  ;;  %3768 = vmatprep.subr.bf16.mxu1 %v3767_v46 }
  0x93   :  { %3213 = vmatmul.mubr.msk.f32.gmra.mrb[14].mxu0 %vm134_vm1, %v129_v21  ;;  %3770 = vmatpush3.bf16.msra.mxu1 %v3767_v46 }
  0x94   :  { %3772 = vmatprep.subr.bf16.mxu1 %v4508_v49 }
 0x14a   :  { %v4511_v50 = vpop.f32.mrb[0].mxu0 }
 0x14b   :  { %v355_v51 = vmul.f32 %v4511_v50, %v4511_v50  ;;  %v4515_v52 = vpop.f32.mrb[1].mxu0 }
 0x14c   :  { %v332_v53 = vadd.f32 %v4511_v50, %v4515_v52  ;;  %v354_v54 = vmul.f32 %v4515_v52, %v4515_v52 }
 0x14e   :  { %v370_v55 = vadd.f32 %v355_v51, %v354_v54  ;;  %v4521_v56 = vpop.f32.mrb[2].mxu0 }
 0x14f   :  { %v4523_v57 = vpop.f32.mrb[3].mxu0  ;;  %v357_v60 = vmul.f32 %v4521_v56, %v4521_v56 }
 0x150   :  { %v333_v58 = vadd.f32 %v332_v53, %v4523_v57  ;;  %v356_v59 = vmul.f32 %v4523_v57, %v4523_v57 }
 0x152   :  { %v371_v61 = vadd.f32 %v370_v55, %v356_v59  ;;  %v4530_v62 = vpop.f32.mrb[4].mxu0  ;;  %v334_v63 = vadd.f32 %v4521_v56, %v333_v58 }
 0x153   :  { %v4533_v0 = vpop.f32.mrb[5].mxu0  ;;  %v359_v4 = vmul.f32 %v4530_v62, %v4530_v62 }
 0x154   :  { %v335_v1 = vadd.f32 %v334_v63, %v4533_v0  ;;  %v358_v2 = vmul.f32 %v4533_v0, %v4533_v0  ;;  %v372_v3 = vadd.f32 %v371_v61, %v357_v60 }
 0x156   :  { %v373_v5 = vadd.f32 %v372_v3, %v358_v2  ;;  %v4540_v6 = vpop.f32.mrb[6].mxu0  ;;  %v336_v7 = vadd.f32 %v4530_v62, %v335_v1 }
 0x157   :  { %v4543_v8 = vpop.f32.mrb[7].mxu0  ;;  %v361_v12 = vmul.f32 %v4540_v6, %v4540_v6 }
 0x158   :  { %v337_v9 = vadd.f32 %v336_v7, %v4543_v8  ;;  %v360_v10 = vmul.f32 %v4543_v8, %v4543_v8  ;;  %v374_v11 = vadd.f32 %v373_v5, %v359_v4 }
 0x15a   :  { %v375_v13 = vadd.f32 %v374_v11, %v360_v10  ;;  %v4550_v14 = vpop.f32.mrb[8].mxu0  ;;  %v338_v15 = vadd.f32 %v4540_v6, %v337_v9  ;;  %v402_v11 = vlaneseq }
 0x15b   :  { %v4553_v16 = vpop.f32.mrb[9].mxu0  ;;  %v363_v20 = vmul.f32 %v4550_v14, %v4550_v14 }
 0x15c   :  { %v339_v17 = vadd.f32 %v338_v15, %v4553_v16  ;;  %v362_v18 = vmul.f32 %v4553_v16, %v4553_v16  ;;  %v376_v19 = vadd.f32 %v375_v13, %v361_v12  ;;  %v4576_v12 = vshrl.u32 %v402_v11, 7  ;;  %v4581_v13 = vld [vmem:[%s5125_s6] sm:$0xff] }
 0x15e   :  { %v377_v21 = vadd.f32 %v376_v19, %v362_v18  ;;  %v4560_v22 = vpop.f32.mrb[10].mxu0  ;;  %v340_v23 = vadd.f32 %v4550_v14, %v339_v17  ;;  %v404_v15 = vsub.s32 0, %v4576_v12 }
 0x15f   :  { %v4563_v24 = vpop.f32.mrb[11].mxu0  ;;  %v365_v28 = vmul.f32 %v4560_v22, %v4560_v22 }
 0x160   :  { %v341_v25 = vadd.f32 %v340_v23, %v4563_v24  ;;  %v364_v26 = vmul.f32 %v4563_v24, %v4563_v24  ;;  %v378_v27 = vadd.f32 %v377_v21, %v363_v20  ;;  %v424_v21 = vsub.s32 4, %v4576_v12 }
 0x162   :  { %v379_v29 = vadd.f32 %v378_v27, %v364_v26  ;;  %v4570_v30 = vpop.f32.mrb[12].mxu0  ;;  %v342_v31 = vadd.f32 %v4560_v22, %v341_v25 }
 0x163   :  { %v313_v32 = vpop.f32.mrb[13].mxu0  ;;  %v367_v36 = vmul.f32 %v4570_v30, %v4570_v30 }
 0x164   :  { %v343_v33 = vadd.f32 %v342_v31, %v313_v32  ;;  %v366_v34 = vmul.f32 %v313_v32, %v313_v32  ;;  %v380_v35 = vadd.f32 %v379_v29, %v365_v28 }
 0x166   :  { %v381_v37 = vadd.f32 %v380_v35, %v366_v34  ;;  %v3214_v38 = vpop.f32.mrb[14].mxu0  ;;  %v344_v39 = vadd.f32 %v4570_v30, %v343_v33 }
 0x167   :  { %v323_v40 = vpop.f32.mrb[15].mxu0  ;;  %v369_v45 = vmul.f32 %v3214_v38, %v3214_v38 }
 0x168   :  { %v345_v41 = vadd.f32 %v344_v39, %v323_v40  ;;  %v368_v43 = vmul.f32 %v323_v40, %v323_v40  ;;  %v382_v44 = vadd.f32 %v381_v37, %v367_v36 }
 0x16a   :  { %v346_v46 = vadd.f32 %v3214_v38, %v345_v41  ;;  %v383_v47 = vadd.f32 %v382_v44, %v368_v43 }
 0x16c   :  { %v347_v48 = vrot.slane %v346_v46, 4  ;;  %v384_v51 = vadd.f32 %v383_v47, %v369_v45 }
 0x16e   :  { %v348_v53 = vadd.f32 %v347_v48, %v346_v46  ;;  %v385_v54 = vrot.slane %v384_v51, 4 }
 0x170   :  { %v349_v55 = vrot.slane %v348_v53, 2  ;;  %v386_v58 = vadd.f32 %v385_v54, %v384_v51 }
 0x172   :  { %v350_v59 = vadd.f32 %v349_v55, %v348_v53  ;;  %v387_v60 = vrot.slane %v386_v58, 2 }
 0x174   :  { %v351_v61 = vrot.slane %v350_v59, 1  ;;  %v388_v63 = vadd.f32 %v387_v60, %v386_v58 }
 0x176   :  { %v352_v1 = vadd.f32 %v351_v61, %v350_v59  ;;  %v389_v2 = vrot.slane %v388_v63, 1 }
 0x178   :  { %v353_v3 = vmul.f32 0.0078125, %v352_v1  ;;  %v390_v4 = vadd.f32 %v389_v2, %v388_v63 }
 0x17a   :  { %v391_v5 = vmul.f32 0.0078125, %v390_v4  ;;  %v392_v7 = vmul.f32 %v353_v3, %v353_v3 }
 0x17c   :  { %v393_v9 = vsub.f32 %v391_v5, %v392_v7 }
 0x17e   :  { %v394_v10 = vadd.f32 1e-05, %v393_v9  ;;  %v516_v9 = vld [vmem:[#allocation9 + $0x10] sm:$0xff] }
 0x180   :  { %4128 = vrsqrt.f32 %v394_v10  ;;  %v517_v10 = vld [vmem:[#allocation9 + $0x18] sm:$0xff] }
 0x18a   :  { %v4129_v17 = vpop.eup %4128 }
 0x18b   :  { %v396_v18 = vmul.f32 %v4129_v17, %v4581_v13  ;;  %v3775_v17 = vpack.c.bf16 %v517_v10, %v516_v9  ;;  %v528_v10 = vld [vmem:[#allocation9 + $0x70] sm:$0xff] }
 0x18d   :  { %v397_v19 = vmul.f32 %v396_v18, %v353_v3  ;;  %v405_v20 = vrot.slane %v396_v18, %v404_v15  ;;  %v518_v18 = vld [vmem:[#allocation9 + $0x20] sm:$0xff] }
 0x18f   :  { %v399_v23 = vrot.slane %v397_v19, 4  ;;  %v420_v25 = vmul.f32 %v405_v20, %v323_v40  ;;  %v421_v26 = vmul.f32 %v3214_v38, %v405_v20  ;;  %v406_v27 = vmul.f32 %v405_v20, %v4515_v52  ;;  %v519_v19 = vld [vmem:[#allocation9 + $0x28] sm:$0xff] }
 0x190   :  { %v407_v28 = vmul.f32 %v4511_v50, %v405_v20  ;;  %v408_v29 = vmul.f32 %v405_v20, %v4523_v57  ;;  %v409_v31 = vmul.f32 %v4521_v56, %v405_v20  ;;  %v410_v33 = vmul.f32 %v405_v20, %v4533_v0 }
 0x191   :  { %v401_v34 = vsub.f32 %v4581_v13, %v399_v23  ;;  %v411_v35 = vmul.f32 %v4530_v62, %v405_v20  ;;  %v412_v36 = vmul.f32 %v405_v20, %v4543_v8  ;;  %v413_v37 = vmul.f32 %v4540_v6, %v405_v20 }
 0x192   :  { %v414_v38 = vmul.f32 %v405_v20, %v4553_v16  ;;  %v415_v52 = vmul.f32 %v4550_v14, %v405_v20  ;;  %v416_v50 = vmul.f32 %v405_v20, %v4563_v24  ;;  %v417_v57 = vmul.f32 %v4560_v22, %v405_v20 }
 0x193   :  { %v425_v39 = vrot.slane %v401_v34, %v424_v21  ;;  %v418_v56 = vmul.f32 %v405_v20, %v313_v32  ;;  %v419_v0 = vmul.f32 %v4570_v30, %v405_v20  ;;  %v3779_v21 = vpack.c.bf16 %v519_v19, %v518_v18  ;;  %v870_v19 = vld [vmem:[#allocation9 + $0x100] sm:$0xff] }
 0x195   :  { %v4600_v40 = vadd.f32 %v425_v39, %v420_v25  ;;  %v4602_v41 = vadd.f32 %v425_v39, %v421_v26  ;;  %v4604_v62 = vadd.f32 %v425_v39, %v406_v27  ;;  %v4606_v8 = vadd.f32 %v425_v39, %v407_v28  ;;  %v520_v25 = vld [vmem:[#allocation9 + $0x30] sm:$0xff]  ;;  %v521_v26 = vld [vmem:[#allocation9 + $0x38] sm:$0xff] }
 0x196   :  { %v4608_v6 = vadd.f32 %v425_v39, %v408_v29  ;;  %v4610_v16 = vadd.f32 %v425_v39, %v409_v31  ;;  %v4612_v14 = vadd.f32 %v425_v39, %v410_v33  ;;  %v4614_v24 = vadd.f32 %v425_v39, %v411_v35  ;;  %v522_v31 = vld [vmem:[#allocation9 + $0x40] sm:$0xff]  ;;  %v523_v33 = vld [vmem:[#allocation9 + $0x48] sm:$0xff] }
 0x197   :  { %v456_v22 = vmax.f32 %v4600_v40, 0.0  ;;  %v457_v30 = vmax.f32 %v4602_v41, 0.0  ;;  %v442_v32 = vmax.f32 %v4604_v62, 0.0  ;;  %v443_v43 = vmax.f32 %v4606_v8, 0.0  ;;  %v1073_v8 = vld [vmem:[#allocation9 + $0x1c8] sm:$0xff] }
 0x198   :  { %v444_v44 = vmax.f32 %v4608_v6, 0.0  ;;  %v445_v45 = vmax.f32 %v4610_v16, 0.0  ;;  %v446_v46 = vmax.f32 %v4612_v14, 0.0  ;;  %v447_v47 = vmax.f32 %v4614_v24, 0.0  ;;  %v1075_v16 = vld [vmem:[#allocation9 + $0x1d8] sm:$0xff]  ;;  %v1077_v24 = vld [vmem:[#allocation9 + $0x1e8] sm:$0xff] }
 0x199   :  { %496 = vst [vmem:[#allocation2 + $0xaa] sm:$0xff] %v456_v22  ;;  %497 = vst [vmem:[#allocation2 + $0xb2] sm:$0xff] %v457_v30  ;;  %v4632_v48 = vadd.f32 %v425_v39, %v412_v36  ;;  %v4634_v51 = vadd.f32 %v425_v39, %v413_v37  ;;  %v4636_v53 = vadd.f32 %v425_v39, %v414_v38  ;;  %v524_v36 = vld [vmem:[#allocation9 + $0x50] sm:$0xff]  ;;  %v525_v37 = vld [vmem:[#allocation9 + $0x58] sm:$0xff] }
 0x19a   :  { %482 = vst [vmem:[#allocation2 + $0x2] sm:$0xff] %v442_v32  ;;  %483 = vst [vmem:[#allocation2 + $0xa] sm:$0xff] %v443_v43  ;;  %v4638_v54 = vadd.f32 %v425_v39, %v415_v52  ;;  %v4648_v55 = vadd.f32 %v425_v39, %v416_v50  ;;  %v4650_v58 = vadd.f32 %v425_v39, %v417_v57  ;;  %v526_v57 = vld [vmem:[#allocation9 + $0x60] sm:$0xff] }
 0x19b   :  { %484 = vst [vmem:[#allocation2 + $0x1a] sm:$0xff] %v444_v44  ;;  %485 = vst [vmem:[#allocation2 + $0x22] sm:$0xff] %v445_v45  ;;  %v4652_v59 = vadd.f32 %v425_v39, %v418_v56  ;;  %v4654_v60 = vadd.f32 %v425_v39, %v419_v0  ;;  %v448_v61 = vmax.f32 %v4632_v48, 0.0  ;;  %v449_v63 = vmax.f32 %v4634_v51, 0.0  ;;  %v527_v39 = vld [vmem:[#allocation9 + $0x68] sm:$0xff]  ;;  %v1258_v51 = vld [vmem:[#allocation9 + $0x200] sm:$0xff] }
 0x19c   :  { %486 = vst [vmem:[#allocation2 + $0x32] sm:$0xff] %v446_v46  ;;  %487 = vst [vmem:[#allocation2 + $0x3a] sm:$0xff] %v447_v47  ;;  %v450_v1 = vmax.f32 %v4636_v53, 0.0  ;;  %v451_v2 = vmax.f32 %v4638_v54, 0.0  ;;  %v452_v3 = vmax.f32 %v4648_v55, 0.0  ;;  %v453_v4 = vmax.f32 %v4650_v58, 0.0 }
 0x19d   :  { %v454_v5 = vmax.f32 %v4652_v59, 0.0  ;;  %v455_v7 = vmax.f32 %v4654_v60, 0.0  ;;  %488 = vst [vmem:[#allocation2 + $0x4a] sm:$0xff] %v448_v61  ;;  %489 = vst [vmem:[#allocation2 + $0x52] sm:$0xff] %v449_v63  ;;  %v3783_v28 = vpack.c.bf16 %v521_v26, %v520_v25  ;;  %v3791_v52 = vpack.c.bf16 %v525_v37, %v524_v36  ;;  %v872_v26 = vld [vmem:[#allocation9 + $0x110] sm:$0xff]  ;;  %v1259_v53 = vld [vmem:[#allocation9 + $0x208] sm:$0xff] }
 0x19e   :  { %490 = vst [vmem:[#allocation2 + $0x62] sm:$0xff] %v450_v1  ;;  %491 = vst [vmem:[#allocation2 + $0x6a] sm:$0xff] %v451_v2  ;;  %v3795_v0 = vpack.c.bf16 %v527_v39, %v526_v57  ;;  %v876_v37 = vld [vmem:[#allocation9 + $0x130] sm:$0xff]  ;;  %v878_v39 = vld [vmem:[#allocation9 + $0x140] sm:$0xff]  ;;  %v3867_v54 = vpack.c.bf16 %v1259_v53, %v1258_v51 }
 0x19f   :  { %492 = vst [vmem:[#allocation2 + $0x7a] sm:$0xff] %v452_v3  ;;  %493 = vst [vmem:[#allocation2 + $0x82] sm:$0xff] %v453_v4  ;;  %v1260_v55 = vld [vmem:[#allocation9 + $0x210] sm:$0xff]  ;;  %v1261_v58 = vld [vmem:[#allocation9 + $0x218] sm:$0xff] }
 0x1a0   :  { %494 = vst [vmem:[#allocation2 + $0x92] sm:$0xff] %v454_v5  ;;  %495 = vst [vmem:[#allocation2 + $0x9a] sm:$0xff] %v455_v7  ;;  %v545_v25 = vld [vmem:[#allocation2 + $0xb1] sm:$0xff]  ;;  %v1630_v53 = vld [vmem:[#allocation11 + $0xa0] sm:$0xff] }
 0x1a1   :  { %v530_v11 = vld [vmem:[#allocation2 + $0x1] sm:$0xff]  ;;  %v531_v15 = vld [vmem:[#allocation2 + $0x9] sm:$0xff] }
 0x1a2   :  { %3247 = vmatprep.mubr.f32.mxu1 %v530_v11  ;;  %v532_v20 = vld [vmem:[#allocation2 + $0x19] sm:$0xff]  ;;  %v533_v23 = vld [vmem:[#allocation2 + $0x21] sm:$0xff]  ;;  %v1263_v60 = vld [vmem:[#allocation9 + $0x228] sm:$0xff] }
 0x1a3   :  { %3248 = vmatmul.mubr.f32.vlgmr.msra.gmra.mrb[0].mxu1 %v531_v15  ;;  %v534_v27 = vld [vmem:[#allocation2 + $0x31] sm:$0xff]  ;;  %v535_v29 = vld [vmem:[#allocation2 + $0x39] sm:$0xff]  ;;  %v1047_v59 = vld [vmem:[#allocation2 + $0x3] sm:$0xff] }
 0x1a4   :  { %3250 = vmatprep.mubr.f32.mxu1 %v532_v20  ;;  %3774 = vmatpush3.bf16.msra.mxu1 %v4508_v49  ;;  %v536_v34 = vld [vmem:[#allocation2 + $0x49] sm:$0xff]  ;;  %v3787_v49 = vpack.c.bf16 %v523_v33, %v522_v31  ;;  %v537_v35 = vld [vmem:[#allocation2 + $0x51] sm:$0xff]  ;;  %v529_v11 = vld [vmem:[#allocation9 + $0x78] sm:$0xff] }
 0x1a5   :  { %3776 = vmatprep.subr.bf16.mxu1 %v3775_v17  ;;  %v538_v38 = vld [vmem:[#allocation2 + $0x61] sm:$0xff]  ;;  %v539_v50 = vld [vmem:[#allocation2 + $0x69] sm:$0xff]  ;;  %v503_v57 = vld [vmem:[#allocation2 + $0x38] sm:$0xff] }
 0x1a6   :  { %v540_v56 = vld [vmem:[#allocation2 + $0x79] sm:$0xff]  ;;  %v541_v9 = vld [vmem:[#allocation2 + $0x81] sm:$0xff]  ;;  %v871_v20 = vld [vmem:[#allocation9 + $0x108] sm:$0xff] }
 0x1a7   :  { %3251 = vmatmul.mubr.f32.gmra.mrb[2].mxu1 %v533_v23  ;;  %v542_v15 = vld [vmem:[#allocation2 + $0x91] sm:$0xff]  ;;  %v543_v18 = vld [vmem:[#allocation2 + $0x99] sm:$0xff]  ;;  %v3803_v23 = vpack.c.bf16 %v871_v20, %v870_v19  ;;  %v499_v31 = vld [vmem:[#allocation2 + $0x8] sm:$0xff] }
 0x1a8   :  { %3253 = vmatprep.mubr.f32.mxu1 %v534_v27  ;;  %3778 = vmatpush3.bf16.msra.mxu1 %v3775_v17  ;;  %v3799_v17 = vpack.c.bf16 %v529_v11, %v528_v10  ;;  %v873_v27 = vld [vmem:[#allocation9 + $0x118] sm:$0xff]  ;;  %v874_v33 = vld [vmem:[#allocation9 + $0x120] sm:$0xff]  ;;  %v505_v10 = vld [vmem:[#allocation2 + $0x50] sm:$0xff] }
 0x1a9   :  { %3780 = vmatprep.subr.bf16.mxu1 %v3779_v21  ;;  %v501_v36 = vld [vmem:[#allocation2 + $0x20] sm:$0xff]  ;;  %v880_v11 = vld [vmem:[#allocation9 + $0x150] sm:$0xff]  ;;  %v507_v19 = vld [vmem:[#allocation2 + $0x68] sm:$0xff] }
 0x1aa   :  { %v882_v20 = vld [vmem:[#allocation9 + $0x160] sm:$0xff]  ;;  %v1051_v41 = vld [vmem:[#allocation2 + $0x33] sm:$0xff] }
 0x1ab   :  { %3254 = vmatmul.mubr.f32.gmra.mrb[4].mxu1 %v535_v29  ;;  %v3807_v29 = vpack.c.bf16 %v873_v27, %v872_v26  ;;  %v509_v26 = vld [vmem:[#allocation2 + $0x80] sm:$0xff]  ;;  %v884_v27 = vld [vmem:[#allocation9 + $0x170] sm:$0xff] }
 0x1ac   :  { %3256 = vmatprep.mubr.f32.mxu1 %v536_v34  ;;  %3782 = vmatpush3.bf16.msra.mxu1 %v3779_v21  ;;  %v544_v21 = vld [vmem:[#allocation2 + $0xa9] sm:$0xff] }
 0x1ad   :  { %3784 = vmatprep.subr.bf16.mxu1 %v3783_v28  ;;  %v875_v34 = vld [vmem:[#allocation9 + $0x128] sm:$0xff] }
 0x1af   :  { %3257 = vmatmul.mubr.f32.gmra.mrb[6].mxu1 %v537_v35  ;;  %v3811_v35 = vpack.c.bf16 %v875_v34, %v874_v33  ;;  %v511_v33 = vld [vmem:[#allocation2 + $0x98] sm:$0xff]  ;;  %v1064_v34 = vld [vmem:[#allocation9 + $0x180] sm:$0xff] }
 0x1b0   :  { %3259 = vmatprep.mubr.f32.mxu1 %v538_v38  ;;  %3786 = vmatpush3.bf16.msra.mxu1 %v3783_v28  ;;  %v498_v28 = vld [vmem:[#allocation2] sm:$0xff] }
 0x1b1   :  { %3788 = vmatprep.subr.bf16.mxu1 %v3787_v49  ;;  %v877_v38 = vld [vmem:[#allocation9 + $0x138] sm:$0xff] }
 0x1b3   :  { %3260 = vmatmul.mubr.f32.gmra.mrb[8].mxu1 %v539_v50  ;;  %v3815_v50 = vpack.c.bf16 %v877_v38, %v876_v37  ;;  %v513_v37 = vld [vmem:[#allocation2 + $0xb0] sm:$0xff]  ;;  %v1066_v38 = vld [vmem:[#allocation9 + $0x190] sm:$0xff] }
 0x1b4   :  { %3262 = vmatprep.mubr.f32.mxu1 %v540_v56  ;;  %3790 = vmatpush3.bf16.msra.mxu1 %v3787_v49  ;;  %v500_v49 = vld [vmem:[#allocation2 + $0x18] sm:$0xff]  ;;  %v879_v56 = vld [vmem:[#allocation9 + $0x148] sm:$0xff] }
 0x1b5   :  { %3792 = vmatprep.subr.bf16.mxu1 %v3791_v52 }
 0x1b7   :  { %3263 = vmatmul.mubr.f32.gmra.mrb[10].mxu1 %v541_v9  ;;  %v3819_v9 = vpack.c.bf16 %v879_v56, %v878_v39  ;;  %v1069_v39 = vld [vmem:[#allocation9 + $0x1a8] sm:$0xff] }
 0x1b8   :  { %3265 = vmatprep.mubr.f32.mxu1 %v542_v15  ;;  %3794 = vmatpush3.bf16.msra.mxu1 %v3791_v52  ;;  %v502_v52 = vld [vmem:[#allocation2 + $0x30] sm:$0xff]  ;;  %v881_v15 = vld [vmem:[#allocation9 + $0x158] sm:$0xff] }
 0x1b9   :  { %3796 = vmatprep.subr.bf16.mxu1 %v3795_v0 }
 0x1bb   :  { %3266 = vmatmul.mubr.f32.gmra.mrb[12].mxu1 %v543_v18  ;;  %v3823_v18 = vpack.c.bf16 %v881_v15, %v880_v11  ;;  %v1053_v11 = vld [vmem:[#allocation2 + $0x4b] sm:$0xff] }
 0x1bc   :  { %3268 = vmatprep.mubr.f32.mxu1 %v544_v21  ;;  %3798 = vmatpush3.bf16.msra.mxu1 %v3795_v0  ;;  %v504_v0 = vld [vmem:[#allocation2 + $0x48] sm:$0xff]  ;;  %v883_v21 = vld [vmem:[#allocation9 + $0x168] sm:$0xff] }
 0x1bd   :  { %3800 = vmatprep.subr.bf16.mxu1 %v3799_v17 }
 0x1bf   :  { %3269 = vmatmul.mubr.f32.gmra.mrb[14].mxu1 %v545_v25  ;;  %v3827_v25 = vpack.c.bf16 %v883_v21, %v882_v20  ;;  %v1055_v20 = vld [vmem:[#allocation2 + $0x63] sm:$0xff] }
 0x1c0   :  { %3802 = vmatpush3.bf16.msra.mxu1 %v3799_v17  ;;  %3303 = vmatprep.mubr.f32.mxu1 %v498_v28  ;;  %v506_v17 = vld [vmem:[#allocation2 + $0x60] sm:$0xff] }
 0x1c1   :  { %3804 = vmatprep.subr.bf16.mxu1 %v3803_v23  ;;  %v885_v28 = vld [vmem:[#allocation9 + $0x178] sm:$0xff] }
 0x1c3   :  { %3304 = vmatmul.mubr.f32.vlgmr.msra.gmra.mrb[0].mxu1 %v499_v31  ;;  %v3831_v31 = vpack.c.bf16 %v885_v28, %v884_v27  ;;  %v1057_v27 = vld [vmem:[#allocation2 + $0x7b] sm:$0xff] }
 0x1c4   :  { %3306 = vmatprep.mubr.f32.mxu1 %v500_v49  ;;  %3806 = vmatpush3.bf16.msra.mxu1 %v3803_v23  ;;  %v508_v23 = vld [vmem:[#allocation2 + $0x78] sm:$0xff]  ;;  %v1065_v49 = vld [vmem:[#allocation9 + $0x188] sm:$0xff] }
 0x1c5   :  { %3808 = vmatprep.subr.bf16.mxu1 %v3807_v29 }
 0x1c7   :  { %3307 = vmatmul.mubr.f32.gmra.mrb[2].mxu1 %v501_v36  ;;  %v3835_v36 = vpack.c.bf16 %v1065_v49, %v1064_v34  ;;  %v1059_v34 = vld [vmem:[#allocation2 + $0x93] sm:$0xff] }
 0x1c8   :  { %3309 = vmatprep.mubr.f32.mxu1 %v502_v52  ;;  %3810 = vmatpush3.bf16.msra.mxu1 %v3807_v29  ;;  %v510_v29 = vld [vmem:[#allocation2 + $0x90] sm:$0xff]  ;;  %v1067_v52 = vld [vmem:[#allocation9 + $0x198] sm:$0xff] }
 0x1c9   :  { %3812 = vmatprep.subr.bf16.mxu1 %v3811_v35 }
 0x1cb   :  { %3310 = vmatmul.mubr.f32.gmra.mrb[4].mxu1 %v503_v57  ;;  %v1068_v57 = vld [vmem:[#allocation9 + $0x1a0] sm:$0xff] }
 0x1cc   :  { %3312 = vmatprep.mubr.f32.mxu1 %v504_v0  ;;  %3814 = vmatpush3.bf16.msra.mxu1 %v3811_v35  ;;  %v512_v35 = vld [vmem:[#allocation2 + $0xa8] sm:$0xff]  ;;  %v3843_v56 = vpack.c.bf16 %v1069_v39, %v1068_v57  ;;  %v1070_v0 = vld [vmem:[#allocation9 + $0x1b0] sm:$0xff] }
 0x1cd   :  { %3816 = vmatprep.subr.bf16.mxu1 %v3815_v50  ;;  %v1244_v57 = vld [vmem:[#allocation2 + $0x24] sm:$0xff]  ;;  %v1245_v39 = vld [vmem:[#allocation2 + $0x34] sm:$0xff] }
 0x1cf   :  { %3313 = vmatmul.mubr.f32.gmra.mrb[6].mxu1 %v505_v10  ;;  %v1267_v10 = vld [vmem:[#allocation9 + $0x248] sm:$0xff] }
 0x1d0   :  { %3315 = vmatprep.mubr.f32.mxu1 %v506_v17  ;;  %3818 = vmatpush3.bf16.msra.mxu1 %v3815_v50  ;;  %v3839_v50 = vpack.c.bf16 %v1067_v52, %v1066_v38  ;;  %v1054_v17 = vld [vmem:[#allocation2 + $0x53] sm:$0xff]  ;;  %v1241_v38 = vld [vmem:[#allocation2 + $0x4] sm:$0xff] }
 0x1d1   :  { %3820 = vmatprep.subr.bf16.mxu1 %v3819_v9  ;;  %v1242_v52 = vld [vmem:[#allocation2 + $0xc] sm:$0xff] }
 0x1d3   :  { %3316 = vmatmul.mubr.f32.gmra.mrb[8].mxu1 %v507_v19  ;;  %v1269_v19 = vld [vmem:[#allocation9 + $0x258] sm:$0xff] }
 0x1d4   :  { %3318 = vmatprep.mubr.f32.mxu1 %v508_v23  ;;  %3822 = vmatpush3.bf16.msra.mxu1 %v3819_v9  ;;  %v1071_v9 = vld [vmem:[#allocation9 + $0x1b8] sm:$0xff]  ;;  %v1056_v23 = vld [vmem:[#allocation2 + $0x6b] sm:$0xff] }
 0x1d5   :  { %3824 = vmatprep.subr.bf16.mxu1 %v3823_v18  ;;  %v3847_v62 = vpack.c.bf16 %v1071_v9, %v1070_v0  ;;  %v1247_v0 = vld [vmem:[#allocation2 + $0x4c] sm:$0xff]  ;;  %v1248_v9 = vld [vmem:[#allocation2 + $0x54] sm:$0xff] }
 0x1d7   :  { %3319 = vmatmul.mubr.f32.gmra.mrb[10].mxu1 %v509_v26  ;;  %v1271_v26 = vld [vmem:[#allocation9 + $0x268] sm:$0xff] }
 0x1d8   :  { %3321 = vmatprep.mubr.f32.mxu1 %v510_v29  ;;  %3826 = vmatpush3.bf16.msra.mxu1 %v3823_v18  ;;  %v1268_v18 = vld [vmem:[#allocation9 + $0x250] sm:$0xff]  ;;  %v1058_v29 = vld [vmem:[#allocation2 + $0x83] sm:$0xff] }
 0x1d9   :  { %3828 = vmatprep.subr.bf16.mxu1 %v3827_v25  ;;  %v3887_v21 = vpack.c.bf16 %v1269_v19, %v1268_v18 }
 0x1db   :  { %3322 = vmatmul.mubr.f32.gmra.mrb[12].mxu1 %v511_v33  ;;  %v1273_v33 = vld [vmem:[#allocation9 + $0x278] sm:$0xff] }
 0x1dc   :  { %3324 = vmatprep.mubr.f32.mxu1 %v512_v35  ;;  %3830 = vmatpush3.bf16.msra.mxu1 %v3827_v25  ;;  %v1270_v25 = vld [vmem:[#allocation9 + $0x260] sm:$0xff]  ;;  %v1060_v35 = vld [vmem:[#allocation2 + $0x9b] sm:$0xff] }
 0x1dd   :  { %3832 = vmatprep.subr.bf16.mxu1 %v3831_v31  ;;  %v3891_v28 = vpack.c.bf16 %v1271_v26, %v1270_v25 }
 0x1df   :  { %3325 = vmatmul.mubr.f32.gmra.mrb[14].mxu1 %v513_v37  ;;  %v1062_v37 = vld [vmem:[#allocation2 + $0xb3] sm:$0xff] }
 0x1e0   :  { %3834 = vmatpush3.bf16.msra.mxu1 %v3831_v31  ;;  %3359 = vmatprep.mubr.f32.mxu1 %v442_v32  ;;  %v1072_v32 = vld [vmem:[#allocation9 + $0x1c0] sm:$0xff]  ;;  %v1272_v31 = vld [vmem:[#allocation9 + $0x270] sm:$0xff] }
 0x1e1   :  { %3836 = vmatprep.subr.bf16.mxu1 %v3835_v36  ;;  %v3851_v6 = vpack.c.bf16 %v1073_v8, %v1072_v32  ;;  %v3895_v49 = vpack.c.bf16 %v1273_v33, %v1272_v31  ;;  %v1250_v32 = vld [vmem:[#allocation2 + $0x6c] sm:$0xff]  ;;  %v1251_v8 = vld [vmem:[#allocation2 + $0x7c] sm:$0xff] }
 0x1e3   :  { %3360 = vmatmul.mubr.f32.vlgmr.msra.gmra.mrb[0].mxu1 %v443_v43  ;;  %v1074_v43 = vld [vmem:[#allocation9 + $0x1d0] sm:$0xff] }
 0x1e4   :  { %3362 = vmatprep.mubr.f32.mxu1 %v444_v44  ;;  %3838 = vmatpush3.bf16.msra.mxu1 %v3835_v36  ;;  %v3855_v14 = vpack.c.bf16 %v1075_v16, %v1074_v43  ;;  %v1076_v44 = vld [vmem:[#allocation9 + $0x1e0] sm:$0xff]  ;;  %v1253_v43 = vld [vmem:[#allocation2 + $0x94] sm:$0xff]  ;;  %v1254_v16 = vld [vmem:[#allocation2 + $0x9c] sm:$0xff] }
 0x1e5   :  { %3840 = vmatprep.subr.bf16.mxu1 %v3839_v50  ;;  %v1061_v36 = vld [vmem:[#allocation2 + $0xab] sm:$0xff] }
 0x1e7   :  { %3363 = vmatmul.mubr.f32.gmra.mrb[2].mxu1 %v445_v45  ;;  %v3859_v45 = vpack.c.bf16 %v1077_v24, %v1076_v44  ;;  %v1256_v44 = vld [vmem:[#allocation2 + $0xb4] sm:$0xff]  ;;  %v1626_v24 = vld [vmem:[#allocation11 + $0x80] sm:$0xff] }
 0x1e8   :  { %3365 = vmatprep.mubr.f32.mxu1 %v446_v46  ;;  %3842 = vmatpush3.bf16.msra.mxu1 %v3839_v50  ;;  %v1078_v46 = vld [vmem:[#allocation9 + $0x1f0] sm:$0xff] }
 0x1e9   :  { %3844 = vmatprep.subr.bf16.mxu1 %v3843_v56  ;;  %v1243_v50 = vld [vmem:[#allocation2 + $0x1c] sm:$0xff] }
 0x1eb   :  { %3366 = vmatmul.mubr.f32.gmra.mrb[4].mxu1 %v447_v47  ;;  %v1079_v47 = vld [vmem:[#allocation9 + $0x1f8] sm:$0xff] }
 0x1ec   :  { %3368 = vmatprep.mubr.f32.mxu1 %v448_v61  ;;  %3846 = vmatpush3.bf16.msra.mxu1 %v3843_v56  ;;  %v3863_v48 = vpack.c.bf16 %v1079_v47, %v1078_v46  ;;  %v3871_v61 = vpack.c.bf16 %v1261_v58, %v1260_v55  ;;  %v1246_v56 = vld [vmem:[#allocation2 + $0x3c] sm:$0xff] }
 0x1ed   :  { %3848 = vmatprep.subr.bf16.mxu1 %v3847_v62  ;;  %v1628_v47 = vld [vmem:[#allocation11 + $0x90] sm:$0xff] }
 0x1ee   :  { %v1632_v58 = vld [vmem:[#allocation11 + $0xb0] sm:$0xff] }
 0x1ef   :  { %3369 = vmatmul.mubr.f32.gmra.mrb[6].mxu1 %v449_v63  ;;  %v1048_v63 = vld [vmem:[#allocation2 + $0xb] sm:$0xff] }
 0x1f0   :  { %3371 = vmatprep.mubr.f32.mxu1 %v450_v1  ;;  %3850 = vmatpush3.bf16.msra.mxu1 %v3847_v62  ;;  %v1262_v1 = vld [vmem:[#allocation9 + $0x220] sm:$0xff] }
 0x1f1   :  { %3852 = vmatprep.subr.bf16.mxu1 %v3851_v6  ;;  %v3875_v40 = vpack.c.bf16 %v1263_v60, %v1262_v1  ;;  %v1249_v62 = vld [vmem:[#allocation2 + $0x64] sm:$0xff]  ;;  %v1635_v1 = vld [vmem:[#allocation11 + $0xc8] sm:$0xff] }
 0x1f3   :  { %3372 = vmatmul.mubr.f32.gmra.mrb[8].mxu1 %v451_v2  ;;  %v1049_v2 = vld [vmem:[#allocation2 + $0x1b] sm:$0xff] }
 0x1f4   :  { %3374 = vmatprep.mubr.f32.mxu1 %v452_v3  ;;  %3854 = vmatpush3.bf16.msra.mxu1 %v3851_v6  ;;  %v1264_v3 = vld [vmem:[#allocation9 + $0x230] sm:$0xff]  ;;  %v1252_v6 = vld [vmem:[#allocation2 + $0x84] sm:$0xff] }
 0x1f5   :  { %3856 = vmatprep.subr.bf16.mxu1 %v3855_v14 }
 0x1f7   :  { %3375 = vmatmul.mubr.f32.gmra.mrb[10].mxu1 %v453_v4  ;;  %v1265_v4 = vld [vmem:[#allocation9 + $0x238] sm:$0xff] }
 0x1f8   :  { %3377 = vmatprep.mubr.f32.mxu1 %v454_v5  ;;  %3858 = vmatpush3.bf16.msra.mxu1 %v3855_v14  ;;  %v1052_v5 = vld [vmem:[#allocation2 + $0x3b] sm:$0xff]  ;;  %v1255_v14 = vld [vmem:[#allocation2 + $0xac] sm:$0xff] }
 0x1f9   :  { %3860 = vmatprep.subr.bf16.mxu1 %v3859_v45 }
 0x1fb   :  { %3378 = vmatmul.mubr.f32.gmra.mrb[12].mxu1 %v455_v7  ;;  %v1266_v7 = vld [vmem:[#allocation9 + $0x240] sm:$0xff] }
 0x1fc   :  { %3380 = vmatprep.mubr.f32.mxu1 %v456_v22  ;;  %3862 = vmatpush3.bf16.msra.mxu1 %v3859_v45  ;;  %v1050_v22 = vld [vmem:[#allocation2 + $0x23] sm:$0xff]  ;;  %v3883_v15 = vpack.c.bf16 %v1267_v10, %v1266_v7  ;;  %v1627_v45 = vld [vmem:[#allocation11 + $0x88] sm:$0xff] }
 0x1fd   :  { %3864 = vmatprep.subr.bf16.mxu1 %v3863_v48  ;;  %v3899_v46 = vpack.c.bf16 %v1627_v45, %v1626_v24  ;;  %v1593_v10 = vld [vmem:[#allocation11] sm:$0xff] }
 0x1ff   :  { %3381 = vmatmul.mubr.f32.gmra.mrb[14].mxu1 %v457_v30  ;;  %v3879_v30 = vpack.c.bf16 %v1265_v4, %v1264_v3  ;;  %3900 = vmatprep.subr.bf16.mxu0 %v3899_v46  ;;  %v1638_v3 = vld [vmem:[#allocation11 + $0xe0] sm:$0xff]  ;;  %v1639_v4 = vld [vmem:[#allocation11 + $0xe8] sm:$0xff] }
 0x200   :  { %3866 = vmatpush3.bf16.msra.mxu1 %v3863_v48  ;;  %3415 = vmatprep.mubr.f32.mxu1 %v1047_v59  ;;  %v1629_v48 = vld [vmem:[#allocation11 + $0x98] sm:$0xff] }
 0x201   :  { %3868 = vmatprep.subr.bf16.mxu1 %v3867_v54  ;;  %3902 = vmatpush3.bf16.msra.mxu0 %v3899_v46  ;;  %v3903_v51 = vpack.c.bf16 %v1629_v48, %v1628_v47  ;;  %v1633_v59 = vld [vmem:[#allocation11 + $0xb8] sm:$0xff] }
 0x203   :  { %3416 = vmatmul.mubr.f32.vlgmr.msra.gmra.mrb[0].mxu1 %v1048_v63  ;;  %3904 = vmatprep.subr.bf16.mxu0 %v3903_v51  ;;  %v1634_v63 = vld [vmem:[#allocation11 + $0xc0] sm:$0xff] }
 0x204   :  { %3418 = vmatprep.mubr.f32.mxu1 %v1049_v2  ;;  %3870 = vmatpush3.bf16.msra.mxu1 %v3867_v54  ;;  %v1631_v54 = vld [vmem:[#allocation11 + $0xa8] sm:$0xff]  ;;  %v3915_v60 = vpack.c.bf16 %v1635_v1, %v1634_v63  ;;  %v1636_v2 = vld [vmem:[#allocation11 + $0xd0] sm:$0xff] }
 0x205   :  { %3872 = vmatprep.subr.bf16.mxu1 %v3871_v61  ;;  %3906 = vmatpush3.bf16.msra.mxu0 %v3903_v51  ;;  %v3907_v55 = vpack.c.bf16 %v1631_v54, %v1630_v53 }
 0x207   :  { %3419 = vmatmul.mubr.f32.gmra.mrb[2].mxu1 %v1050_v22  ;;  %3908 = vmatprep.subr.bf16.mxu0 %v3907_v55 }
 0x208   :  { %3421 = vmatprep.mubr.f32.mxu1 %v1051_v41  ;;  %3874 = vmatpush3.bf16.msra.mxu1 %v3871_v61  ;;  %v3911_v61 = vpack.c.bf16 %v1633_v59, %v1632_v58  ;;  %v3923_v41 = vpack.c.bf16 %v1639_v4, %v1638_v3 }
 0x209   :  { %3876 = vmatprep.subr.bf16.mxu1 %v3875_v40  ;;  %3910 = vmatpush3.bf16.msra.mxu0 %v3907_v55 }
 0x20a   :  { %3912 = vmatprep.subr.bf16.mxu0 %v3911_v61 }
 0x20b   :  { %3422 = vmatmul.mubr.f32.gmra.mrb[4].mxu1 %v1052_v5  ;;  %v1641_v5 = vld [vmem:[#allocation11 + $0xf8] sm:$0xff] }
 0x20c   :  { %3424 = vmatprep.mubr.f32.mxu1 %v1053_v11  ;;  %3878 = vmatpush3.bf16.msra.mxu1 %v3875_v40  ;;  %v1637_v40 = vld [vmem:[#allocation11 + $0xd8] sm:$0xff]  ;;  %v1594_v11 = vld [vmem:[#allocation11 + $0x8] sm:$0xff] }
 0x20d   :  { %3880 = vmatprep.subr.bf16.mxu1 %v3879_v30  ;;  %3914 = vmatpush3.bf16.msra.mxu0 %v3911_v61  ;;  %v3919_v22 = vpack.c.bf16 %v1637_v40, %v1636_v2 }
 0x20e   :  { %3916 = vmatprep.subr.bf16.mxu0 %v3915_v60 }
 0x20f   :  { %3425 = vmatmul.mubr.f32.gmra.mrb[6].mxu1 %v1054_v17 }
 0x210   :  { %3427 = vmatprep.mubr.f32.mxu1 %v1055_v20  ;;  %3882 = vmatpush3.bf16.msra.mxu1 %v3879_v30  ;;  %v1640_v30 = vld [vmem:[#allocation11 + $0xf0] sm:$0xff] }
 0x211   :  { %3884 = vmatprep.subr.bf16.mxu1 %v3883_v15  ;;  %3918 = vmatpush3.bf16.msra.mxu0 %v3915_v60  ;;  %v3927_v7 = vpack.c.bf16 %v1641_v5, %v1640_v30 }
 0x212   :  { %3920 = vmatprep.subr.bf16.mxu0 %v3919_v22 }
 0x213   :  { %3428 = vmatmul.mubr.f32.gmra.mrb[8].mxu1 %v1056_v23 }
 0x214   :  { %3430 = vmatprep.mubr.f32.mxu1 %v1057_v27  ;;  %3886 = vmatpush3.bf16.msra.mxu1 %v3883_v15  ;;  %v4713_v15 = vpack.c.bf16 %v1594_v11, %v1593_v10 }
 0x215   :  { %3888 = vmatprep.subr.bf16.mxu1 %v3887_v21  ;;  %3922 = vmatpush3.bf16.msra.mxu0 %v3919_v22 }
 0x216   :  { %3924 = vmatprep.subr.bf16.mxu0 %v3923_v41 }
 0x217   :  { %3431 = vmatmul.mubr.f32.gmra.mrb[10].mxu1 %v1058_v29 }
 0x218   :  { %3433 = vmatprep.mubr.f32.mxu1 %v1059_v34  ;;  %3890 = vmatpush3.bf16.msra.mxu1 %v3887_v21 }
 0x219   :  { %3892 = vmatprep.subr.bf16.mxu1 %v3891_v28  ;;  %3926 = vmatpush3.bf16.msra.mxu0 %v3923_v41 }
 0x21a   :  { %3928 = vmatprep.subr.bf16.mxu0 %v3927_v7 }
 0x21b   :  { %3434 = vmatmul.mubr.f32.gmra.mrb[12].mxu1 %v1060_v35 }
 0x21c   :  { %3436 = vmatprep.mubr.f32.mxu1 %v1061_v36  ;;  %3894 = vmatpush3.bf16.msra.mxu1 %v3891_v28 }
 0x21d   :  { %3896 = vmatprep.subr.bf16.mxu1 %v3895_v49  ;;  %3930 = vmatpush3.bf16.msra.mxu0 %v3927_v7 }
 0x21e   :  { %3932 = vmatprep.subr.bf16.mxu0 %v4713_v15 }
 0x21f   :  { %3437 = vmatmul.mubr.f32.gmra.mrb[14].mxu1 %v1062_v37 }
 0x220   :  { %3898 = vmatpush3.bf16.msra.mxu1 %v3895_v49  ;;  %3471 = vmatprep.mubr.f32.mxu1 %v1241_v38 }
 0x223   :  { %3472 = vmatmul.mubr.f32.vlgmr.msra.gmra.mrb[0].mxu1 %v1242_v52 }
 0x224   :  { %3474 = vmatprep.mubr.f32.mxu1 %v1243_v50 }
 0x227   :  { %3475 = vmatmul.mubr.f32.gmra.mrb[2].mxu1 %v1244_v57 }
 0x228   :  { %3477 = vmatprep.mubr.f32.mxu1 %v1245_v39 }
 0x22b   :  { %3478 = vmatmul.mubr.f32.gmra.mrb[4].mxu1 %v1246_v56 }
 0x22c   :  { %3480 = vmatprep.mubr.f32.mxu1 %v1247_v0 }
 0x22f   :  { %3481 = vmatmul.mubr.f32.gmra.mrb[6].mxu1 %v1248_v9 }
 0x230   :  { %3483 = vmatprep.mubr.f32.mxu1 %v1249_v62 }
 0x233   :  { %3484 = vmatmul.mubr.f32.gmra.mrb[8].mxu1 %v1250_v32 }
 0x234   :  { %3486 = vmatprep.mubr.f32.mxu1 %v1251_v8 }
 0x237   :  { %3487 = vmatmul.mubr.f32.gmra.mrb[10].mxu1 %v1252_v6 }
 0x238   :  { %3489 = vmatprep.mubr.f32.mxu1 %v1253_v43 }
 0x23b   :  { %3490 = vmatmul.mubr.f32.gmra.mrb[12].mxu1 %v1254_v16 }
 0x23c   :  { %3492 = vmatprep.mubr.f32.mxu1 %v1255_v14 }
 0x23f   :  { %3493 = vmatmul.mubr.f32.gmra.mrb[14].mxu1 %v1256_v44 }
 0x240   :  { %3726 = vmatprep.mubr.msk.f32.mxu1 %vm4327_vm5, %v4326_v42 }
 0x2f6   :  { %v4716_v17 = vpop.f32.mrb[0].mxu1 }
 0x2f7   :  { %v1458_v18 = vmul.f32 %v4716_v17, %v4716_v17  ;;  %v4720_v19 = vpop.f32.mrb[1].mxu1 }
 0x2f8   :  { %v1435_v20 = vadd.f32 %v4716_v17, %v4720_v19  ;;  %v1457_v21 = vmul.f32 %v4720_v19, %v4720_v19 }
 0x2fa   :  { %v1473_v23 = vadd.f32 %v1458_v18, %v1457_v21  ;;  %v4726_v25 = vpop.f32.mrb[2].mxu1 }
 0x2fb   :  { %v4728_v26 = vpop.f32.mrb[3].mxu1  ;;  %v1460_v29 = vmul.f32 %v4726_v25, %v4726_v25 }
 0x2fc   :  { %v1436_v27 = vadd.f32 %v1435_v20, %v4728_v26  ;;  %v1459_v28 = vmul.f32 %v4728_v26, %v4728_v26 }
 0x2fe   :  { %v1474_v31 = vadd.f32 %v1473_v23, %v1459_v28  ;;  %v4735_v33 = vpop.f32.mrb[4].mxu1  ;;  %v1437_v34 = vadd.f32 %v4726_v25, %v1436_v27 }
 0x2ff   :  { %v4738_v49 = vpop.f32.mrb[5].mxu1  ;;  %v1462_v38 = vmul.f32 %v4735_v33, %v4735_v33 }
 0x300   :  { %v1438_v35 = vadd.f32 %v1437_v34, %v4738_v49  ;;  %v1461_v36 = vmul.f32 %v4738_v49, %v4738_v49  ;;  %v1475_v37 = vadd.f32 %v1474_v31, %v1460_v29 }
 0x302   :  { %v1476_v52 = vadd.f32 %v1475_v37, %v1461_v36  ;;  %v4745_v50 = vpop.f32.mrb[6].mxu1  ;;  %v1439_v57 = vadd.f32 %v4735_v33, %v1438_v35 }
 0x303   :  { %v4748_v39 = vpop.f32.mrb[7].mxu1  ;;  %v1464_v62 = vmul.f32 %v4745_v50, %v4745_v50 }
 0x304   :  { %v1440_v56 = vadd.f32 %v1439_v57, %v4748_v39  ;;  %v1463_v0 = vmul.f32 %v4748_v39, %v4748_v39  ;;  %v1477_v9 = vadd.f32 %v1476_v52, %v1462_v38 }
 0x306   :  { %v1478_v32 = vadd.f32 %v1477_v9, %v1463_v0  ;;  %v4755_v8 = vpop.f32.mrb[8].mxu1  ;;  %v1441_v6 = vadd.f32 %v4745_v50, %v1440_v56 }
 0x307   :  { %v4758_v43 = vpop.f32.mrb[9].mxu1  ;;  %v1466_v24 = vmul.f32 %v4755_v8, %v4755_v8 }
 0x308   :  { %v1442_v16 = vadd.f32 %v1441_v6, %v4758_v43  ;;  %v1465_v14 = vmul.f32 %v4758_v43, %v4758_v43  ;;  %v1479_v44 = vadd.f32 %v1478_v32, %v1464_v62  ;;  %v1507_v32 = vsub.s32 1, %v4576_v12 }
 0x30a   :  { %v1480_v45 = vadd.f32 %v1479_v44, %v1465_v14  ;;  %v4765_v46 = vpop.f32.mrb[10].mxu1  ;;  %v1443_v47 = vadd.f32 %v4755_v8, %v1442_v16 }
 0x30b   :  { %v4768_v48 = vpop.f32.mrb[11].mxu1  ;;  %v1468_v55 = vmul.f32 %v4765_v46, %v4765_v46 }
 0x30c   :  { %v1444_v51 = vadd.f32 %v1443_v47, %v4768_v48  ;;  %v1467_v53 = vmul.f32 %v4768_v48, %v4768_v48  ;;  %v1481_v54 = vadd.f32 %v1480_v45, %v1466_v24  ;;  %v1527_v24 = vsub.s32 5, %v4576_v12 }
 0x30e   :  { %v1482_v58 = vadd.f32 %v1481_v54, %v1467_v53  ;;  %v4775_v59 = vpop.f32.mrb[12].mxu1  ;;  %v1445_v61 = vadd.f32 %v4765_v46, %v1444_v51 }
 0x30f   :  { %v1400_v63 = vpop.f32.mrb[13].mxu1  ;;  %v1470_v40 = vmul.f32 %v4775_v59, %v4775_v59 }
 0x310   :  { %v1446_v1 = vadd.f32 %v1445_v61, %v1400_v63  ;;  %v1469_v60 = vmul.f32 %v1400_v63, %v1400_v63  ;;  %v1483_v2 = vadd.f32 %v1482_v58, %v1468_v55  ;;  %v1595_v58 = vld [vmem:[#allocation11 + $0x10] sm:$0xff] }
 0x312   :  { %v1484_v22 = vadd.f32 %v1483_v2, %v1469_v60  ;;  %v3494_v3 = vpop.f32.mrb[14].mxu1  ;;  %v1447_v4 = vadd.f32 %v4775_v59, %v1446_v1  ;;  %v1596_v2 = vld [vmem:[#allocation11 + $0x18] sm:$0xff] }
 0x313   :  { %v1410_v41 = vpop.f32.mrb[15].mxu1  ;;  %v1472_v10 = vmul.f32 %v3494_v3, %v3494_v3 }
 0x314   :  { %v1448_v30 = vadd.f32 %v1447_v4, %v1410_v41  ;;  %v1471_v5 = vmul.f32 %v1410_v41, %v1410_v41  ;;  %v1485_v7 = vadd.f32 %v1484_v22, %v1470_v40  ;;  %v1598_v40 = vld [vmem:[#allocation11 + $0x28] sm:$0xff] }
 0x316   :  { %v1449_v11 = vadd.f32 %v3494_v3, %v1448_v30  ;;  %v1486_v18 = vadd.f32 %v1485_v7, %v1471_v5  ;;  %v3935_v7 = vpack.c.bf16 %v1596_v2, %v1595_v58  ;;  %v1606_v58 = vld [vmem:[#allocation11 + $0x68] sm:$0xff] }
 0x318   :  { %v1450_v20 = vrot.slane %v1449_v11, 4  ;;  %v1487_v21 = vadd.f32 %v1486_v18, %v1472_v10 }
 0x31a   :  { %v1451_v23 = vadd.f32 %v1450_v20, %v1449_v11  ;;  %v1488_v27 = vrot.slane %v1487_v21, 4 }
 0x31c   :  { %v1452_v28 = vrot.slane %v1451_v23, 2  ;;  %v1489_v29 = vadd.f32 %v1488_v27, %v1487_v21 }
 0x31e   :  { %v1453_v31 = vadd.f32 %v1452_v28, %v1451_v23  ;;  %v1490_v34 = vrot.slane %v1489_v29, 2 }
 0x320   :  { %v1454_v35 = vrot.slane %v1453_v31, 1  ;;  %v1491_v36 = vadd.f32 %v1490_v34, %v1489_v29 }
 0x322   :  { %v1455_v37 = vadd.f32 %v1454_v35, %v1453_v31  ;;  %v1492_v38 = vrot.slane %v1491_v36, 1 }
 0x324   :  { %v1456_v52 = vmul.f32 0.0078125, %v1455_v37  ;;  %v1493_v57 = vadd.f32 %v1492_v38, %v1491_v36 }
 0x326   :  { %v1494_v56 = vmul.f32 0.0078125, %v1493_v57  ;;  %v1495_v0 = vmul.f32 %v1456_v52, %v1456_v52 }
 0x328   :  { %v1496_v9 = vsub.f32 %v1494_v56, %v1495_v0 }
 0x32a   :  { %v1497_v62 = vadd.f32 1e-05, %v1496_v9 }
 0x32c   :  { %4130 = vrsqrt.f32 %v1497_v62 }
 0x336   :  { %v4131_v6 = vpop.eup %4130 }
 0x337   :  { %v1499_v16 = vmul.f32 %v4131_v6, %v4581_v13  ;;  %v4793_v13 = vld [vmem:[%s5125_s6] sm:$0xff] }
 0x339   :  { %v1500_v14 = vmul.f32 %v1499_v16, %v1456_v52  ;;  %v1508_v44 = vrot.slane %v1499_v16, %v1507_v32 }
 0x33b   :  { %v1502_v45 = vrot.slane %v1500_v14, 4  ;;  %v1523_v47 = vmul.f32 %v1508_v44, %v1410_v41  ;;  %v1509_v51 = vmul.f32 %v1508_v44, %v4720_v19  ;;  %v1510_v53 = vmul.f32 %v4716_v17, %v1508_v44  ;;  %v1597_v19 = vld [vmem:[#allocation11 + $0x20] sm:$0xff]  ;;  %v1599_v14 = vld [vmem:[#allocation11 + $0x30] sm:$0xff] }
 0x33c   :  { %v1511_v54 = vmul.f32 %v1508_v44, %v4728_v26  ;;  %v1512_v55 = vmul.f32 %v4726_v25, %v1508_v44  ;;  %v1513_v61 = vmul.f32 %v1508_v44, %v4738_v49  ;;  %v1514_v1 = vmul.f32 %v4735_v33, %v1508_v44 }
 0x33d   :  { %v1504_v60 = vsub.f32 %v4793_v13, %v1502_v45  ;;  %v1515_v17 = vmul.f32 %v1508_v44, %v4748_v39  ;;  %v1516_v26 = vmul.f32 %v4745_v50, %v1508_v44  ;;  %v1517_v25 = vmul.f32 %v1508_v44, %v4758_v43  ;;  %v1602_v45 = vld [vmem:[#allocation11 + $0x48] sm:$0xff] }
 0x33e   :  { %v1518_v49 = vmul.f32 %v4755_v8, %v1508_v44  ;;  %v1519_v33 = vmul.f32 %v1508_v44, %v4768_v48  ;;  %v1520_v22 = vmul.f32 %v4765_v46, %v1508_v44  ;;  %v1521_v4 = vmul.f32 %v1508_v44, %v1400_v63 }
 0x33f   :  { %v1528_v41 = vrot.slane %v1504_v60, %v1527_v24  ;;  %v1522_v30 = vmul.f32 %v4775_v59, %v1508_v44  ;;  %v1524_v5 = vmul.f32 %v3494_v3, %v1508_v44  ;;  %v4803_v10 = vpack.c.bf16 %v1598_v40, %v1597_v19  ;;  %v1600_v44 = vld [vmem:[#allocation11 + $0x38] sm:$0xff]  ;;  %v1601_v24 = vld [vmem:[#allocation11 + $0x40] sm:$0xff]  ;;  %v1950_v40 = vld [vmem:[#allocation11 + $0x108] sm:$0xff] }
 0x340   :  { %v1608_v60 = vld [vmem:[#allocation11 + $0x78] sm:$0xff]  ;;  %v1949_v19 = vld [vmem:[#allocation11 + $0x100] sm:$0xff] }
 0x341   :  { %v4805_v11 = vadd.f32 %v1528_v41, %v1523_v47  ;;  %v1529_v39 = vadd.f32 %v1528_v41, %v1509_v51  ;;  %v1530_v50 = vadd.f32 %v1528_v41, %v1510_v53  ;;  %v1531_v18 = vadd.f32 %v1528_v41, %v1511_v54  ;;  %v1603_v51 = vld [vmem:[#allocation11 + $0x50] sm:$0xff]  ;;  %v1604_v53 = vld [vmem:[#allocation11 + $0x58] sm:$0xff] }
 0x342   :  { %v1532_v43 = vadd.f32 %v1528_v41, %v1512_v55  ;;  %v1533_v20 = vadd.f32 %v1528_v41, %v1513_v61  ;;  %v1534_v8 = vadd.f32 %v1528_v41, %v1514_v1  ;;  %v1535_v21 = vadd.f32 %v1528_v41, %v1515_v17  ;;  %v1605_v55 = vld [vmem:[#allocation11 + $0x60] sm:$0xff]  ;;  %v1607_v1 = vld [vmem:[#allocation11 + $0x70] sm:$0xff] }
 0x343   :  { %v1559_v48 = vmax.f32 %v4805_v11, 0.0  ;;  %v1545_v46 = vmax.f32 %v1529_v39, 0.0  ;;  %v1546_v63 = vmax.f32 %v1530_v50, 0.0  ;;  %v1547_v23 = vmax.f32 %v1531_v18, 0.0  ;;  %v1956_v11 = vld [vmem:[#allocation11 + $0x138] sm:$0xff] }
 0x344   :  { %v1548_v27 = vmax.f32 %v1532_v43, 0.0  ;;  %v1549_v59 = vmax.f32 %v1533_v20, 0.0  ;;  %v1550_v3 = vmax.f32 %v1534_v8, 0.0  ;;  %v1551_v28 = vmax.f32 %v1535_v21, 0.0  ;;  %v1957_v43 = vld [vmem:[#allocation11 + $0x140] sm:$0xff]  ;;  %v1958_v20 = vld [vmem:[#allocation11 + $0x148] sm:$0xff] }
 0x345   :  { %1575 = vst [vmem:[#allocation2 + $0xaa] sm:$0xff] %v1559_v48  ;;  %1561 = vst [vmem:[#allocation2 + $0x2] sm:$0xff] %v1545_v46  ;;  %3527 = vmatprep.mubr.f32.mxu0 %v1545_v46  ;;  %v1536_v29 = vadd.f32 %v1528_v41, %v1516_v26  ;;  %v1537_v31 = vadd.f32 %v1528_v41, %v1517_v25  ;;  %v1538_v34 = vadd.f32 %v1528_v41, %v1518_v49  ;;  %v1951_v26 = vld [vmem:[#allocation11 + $0x110] sm:$0xff]  ;;  %v1952_v25 = vld [vmem:[#allocation11 + $0x118] sm:$0xff] }
 0x346   :  { %1562 = vst [vmem:[#allocation2 + $0xa] sm:$0xff] %v1546_v63  ;;  %1563 = vst [vmem:[#allocation2 + $0x1a] sm:$0xff] %v1547_v23  ;;  %v1539_v35 = vadd.f32 %v1528_v41, %v1519_v33  ;;  %3528 = vmatmul.mubr.f32.vlgmr.msra.gmra.mrb[16].mxu0 %v1546_v63  ;;  %v1540_v36 = vadd.f32 %v1528_v41, %v1520_v22  ;;  %v1541_v37 = vadd.f32 %v1528_v41, %v1521_v4  ;;  %v1953_v4 = vld [vmem:[#allocation11 + $0x120] sm:$0xff]  ;;  %v1959_v46 = vld [vmem:[#allocation11 + $0x150] sm:$0xff] }
 0x347   :  { %1564 = vst [vmem:[#allocation2 + $0x22] sm:$0xff] %v1548_v27  ;;  %1565 = vst [vmem:[#allocation2 + $0x32] sm:$0xff] %v1549_v59  ;;  %v1542_v38 = vadd.f32 %v1528_v41, %v1522_v30  ;;  %v4810_v52 = vadd.f32 %v1528_v41, %v1524_v5  ;;  %3530 = vmatprep.mubr.f32.mxu0 %v1547_v23  ;;  %3934 = vmatpush3.bf16.msra.mxu0 %v4713_v15  ;;  %v1552_v57 = vmax.f32 %v1536_v29, 0.0  ;;  %v1954_v41 = vld [vmem:[#allocation11 + $0x128] sm:$0xff]  ;;  %v1960_v63 = vld [vmem:[#allocation11 + $0x158] sm:$0xff] }
 0x348   :  { %1566 = vst [vmem:[#allocation2 + $0x3a] sm:$0xff] %v1550_v3  ;;  %1567 = vst [vmem:[#allocation2 + $0x4a] sm:$0xff] %v1551_v28  ;;  %v1553_v56 = vmax.f32 %v1537_v31, 0.0  ;;  %v1554_v0 = vmax.f32 %v1538_v34, 0.0  ;;  %v1555_v9 = vmax.f32 %v1539_v35, 0.0  ;;  %3936 = vmatprep.subr.bf16.mxu0 %v3935_v7  ;;  %v1556_v62 = vmax.f32 %v1540_v36, 0.0 }
 0x349   :  { %v1557_v32 = vmax.f32 %v1541_v37, 0.0  ;;  %v1558_v6 = vmax.f32 %v1542_v38, 0.0  ;;  %v1560_v16 = vmax.f32 %v4810_v52, 0.0  ;;  %1568 = vst [vmem:[#allocation2 + $0x52] sm:$0xff] %v1552_v57  ;;  %v3943_v15 = vpack.c.bf16 %v1600_v44, %v1599_v14  ;;  %v1963_v35 = vld [vmem:[#allocation11 + $0x170] sm:$0xff]  ;;  %v1964_v36 = vld [vmem:[#allocation11 + $0x178] sm:$0xff] }
 0x34a   :  { %1569 = vst [vmem:[#allocation2 + $0x62] sm:$0xff] %v1553_v56  ;;  %1570 = vst [vmem:[#allocation2 + $0x6a] sm:$0xff] %v1554_v0  ;;  %3531 = vmatmul.mubr.f32.gmra.mrb[18].mxu0 %v1548_v27  ;;  %v3947_v47 = vpack.c.bf16 %v1602_v45, %v1601_v24  ;;  %v3951_v54 = vpack.c.bf16 %v1604_v53, %v1603_v51  ;;  %v3955_v61 = vpack.c.bf16 %v1606_v58, %v1605_v55 }
 0x34b   :  { %1571 = vst [vmem:[#allocation2 + $0x7a] sm:$0xff] %v1555_v9  ;;  %1572 = vst [vmem:[#allocation2 + $0x82] sm:$0xff] %v1556_v62  ;;  %3533 = vmatprep.mubr.f32.mxu0 %v1549_v59  ;;  %3938 = vmatpush3.bf16.msra.mxu0 %v3935_v7  ;;  %v3959_v2 = vpack.c.bf16 %v1608_v60, %v1607_v1  ;;  %v3963_v17 = vpack.c.bf16 %v1950_v40, %v1949_v19  ;;  %v4138_v1 = vld [vmem:[#allocation3 + $0x8] sm:$0xff]  ;;  %v4139_v60 = vld [vmem:[#allocation3 + $0x10] sm:$0xff] }
 0x34c   :  { %1573 = vst [vmem:[#allocation2 + $0x92] sm:$0xff] %v1557_v32  ;;  %1574 = vst [vmem:[#allocation2 + $0x9a] sm:$0xff] %v1558_v6  ;;  %3940 = vmatprep.subr.bf16.mxu0 %v4803_v10  ;;  %v1577_v49 = vld [vmem:[#allocation2 + $0x1] sm:$0xff]  ;;  %v3967_v33 = vpack.c.bf16 %v1952_v25, %v1951_v26  ;;  %v3971_v5 = vpack.c.bf16 %v1954_v41, %v1953_v4  ;;  %v3979_v21 = vpack.c.bf16 %v1958_v20, %v1957_v43  ;;  %v4144_v26 = vld [vmem:[#allocation3 + $0x38] sm:$0xff] }
 0x34d   :  { %1576 = vst [vmem:[#allocation2 + $0xb2] sm:$0xff] %v1560_v16  ;;  %v1578_v22 = vld [vmem:[#allocation2 + $0x9] sm:$0xff]  ;;  %v1579_v30 = vld [vmem:[#allocation2 + $0x19] sm:$0xff]  ;;  %v3983_v27 = vpack.c.bf16 %v1960_v63, %v1959_v46  ;;  %v3991_v38 = vpack.c.bf16 %v1964_v36, %v1963_v35 }
 0x34e   :  { %3534 = vmatmul.mubr.f32.gmra.mrb[20].mxu0 %v1550_v3  ;;  %v1580_v7 = vld [vmem:[#allocation2 + $0x21] sm:$0xff]  ;;  %v1581_v39 = vld [vmem:[#allocation2 + $0x31] sm:$0xff] }
 0x34f   :  { %3536 = vmatprep.mubr.f32.mxu0 %v1551_v28  ;;  %3942 = vmatpush3.bf16.msra.mxu0 %v4803_v10  ;;  %v1955_v10 = vld [vmem:[#allocation11 + $0x130] sm:$0xff]  ;;  %v1583_v8 = vld [vmem:[#allocation2 + $0x49] sm:$0xff]  ;;  %v4141_v19 = vld [vmem:[#allocation3 + $0x20] sm:$0xff] }
 0x350   :  { %3944 = vmatprep.subr.bf16.mxu0 %v3943_v15  ;;  %v3975_v50 = vpack.c.bf16 %v1956_v11, %v1955_v10  ;;  %v1582_v18 = vld [vmem:[#allocation2 + $0x39] sm:$0xff]  ;;  %v1961_v3 = vld [vmem:[#allocation11 + $0x160] sm:$0xff]  ;;  %v1962_v28 = vld [vmem:[#allocation11 + $0x168] sm:$0xff] }
 0x351   :  { %v1585_v23 = vld [vmem:[#allocation2 + $0x61] sm:$0xff]  ;;  %v1586_v59 = vld [vmem:[#allocation2 + $0x69] sm:$0xff]  ;;  %v3987_v31 = vpack.c.bf16 %v1962_v28, %v1961_v3 }
 0x352   :  { %3537 = vmatmul.mubr.f32.gmra.mrb[22].mxu0 %v1552_v57  ;;  %v1587_v29 = vld [vmem:[#allocation2 + $0x79] sm:$0xff]  ;;  %v1588_v34 = vld [vmem:[#allocation2 + $0x81] sm:$0xff]  ;;  %v1591_v57 = vld [vmem:[#allocation2 + $0xa9] sm:$0xff] }
 0x353   :  { %3539 = vmatprep.mubr.f32.mxu0 %v1553_v56  ;;  %3946 = vmatpush3.bf16.msra.mxu0 %v3943_v15  ;;  %v1589_v37 = vld [vmem:[#allocation2 + $0x91] sm:$0xff]  ;;  %v1590_v52 = vld [vmem:[#allocation2 + $0x99] sm:$0xff]  ;;  %v1940_v24 = vld [vmem:[#allocation2 + $0x63] sm:$0xff] }
 0x354   :  { %3948 = vmatprep.subr.bf16.mxu0 %v3947_v47  ;;  %v1592_v56 = vld [vmem:[#allocation2 + $0xb1] sm:$0xff]  ;;  %v1937_v14 = vld [vmem:[#allocation2 + $0x3b] sm:$0xff]  ;;  %v1943_v51 = vld [vmem:[#allocation2 + $0x83] sm:$0xff] }
 0x355   :  { %v1938_v44 = vld [vmem:[#allocation2 + $0x4b] sm:$0xff]  ;;  %v1939_v15 = vld [vmem:[#allocation2 + $0x53] sm:$0xff]  ;;  %v4145_v25 = vld [vmem:[#allocation3 + $0x40] sm:$0xff] }
 0x356   :  { %3540 = vmatmul.mubr.f32.gmra.mrb[24].mxu0 %v1554_v0  ;;  %v2236_v0 = vld [vmem:[%s5124_s5] sm:$0xf]  ;;  %v1941_v45 = vld [vmem:[#allocation2 + $0x6b] sm:$0xff]  ;;  %v1944_v53 = vld [vmem:[#allocation2 + $0x93] sm:$0xff] }
 0x357   :  { %3542 = vmatprep.mubr.f32.mxu0 %v1555_v9  ;;  %3950 = vmatpush3.bf16.msra.mxu0 %v3947_v47  ;;  %v1932_v9 = vld [vmem:[#allocation2 + $0x3] sm:$0xff]  ;;  %v1942_v47 = vld [vmem:[#allocation2 + $0x7b] sm:$0xff]  ;;  %v1946_v55 = vld [vmem:[#allocation2 + $0xab] sm:$0xff] }
 0x358   :  { %3952 = vmatprep.subr.bf16.mxu0 %v3951_v54  ;;  %v1947_v58 = vld [vmem:[#allocation2 + $0xb3] sm:$0xff]  ;;  %v4142_v40 = vld [vmem:[#allocation3 + $0x28] sm:$0xff]  ;;  %v4149_v4 = vld [vmem:[#allocation3 + $0x60] sm:$0xff] }
 0x359   :  { %v4150_v41 = vld [vmem:[#allocation3 + $0x68] sm:$0xff] }
 0x35a   :  { %3543 = vmatmul.mubr.f32.gmra.mrb[26].mxu0 %v1556_v62  ;;  %v1933_v62 = vld [vmem:[#allocation2 + $0xb] sm:$0xff] }
 0x35b   :  { %3545 = vmatprep.mubr.f32.mxu0 %v1557_v32  ;;  %3954 = vmatpush3.bf16.msra.mxu0 %v3951_v54  ;;  %v1934_v32 = vld [vmem:[#allocation2 + $0x1b] sm:$0xff] }
 0x35c   :  { %3956 = vmatprep.subr.bf16.mxu0 %v3955_v61  ;;  %v1945_v54 = vld [vmem:[#allocation2 + $0x9b] sm:$0xff] }
 0x35e   :  { %3546 = vmatmul.mubr.f32.gmra.mrb[28].mxu0 %v1558_v6  ;;  %v1935_v6 = vld [vmem:[#allocation2 + $0x23] sm:$0xff] }
 0x35f   :  { %3548 = vmatprep.mubr.f32.mxu0 %v1559_v48  ;;  %3958 = vmatpush3.bf16.msra.mxu0 %v3955_v61  ;;  %v1584_v48 = vld [vmem:[#allocation2 + $0x51] sm:$0xff]  ;;  %v4137_v61 = vld [vmem:[#allocation3] sm:$0xff] }
 0x360   :  { %3960 = vmatprep.subr.bf16.mxu0 %v3959_v2 }
 0x362   :  { %3549 = vmatmul.mubr.f32.gmra.mrb[30].mxu0 %v1560_v16  ;;  %v1936_v16 = vld [vmem:[#allocation2 + $0x33] sm:$0xff] }
 0x363   :  { %3962 = vmatpush3.bf16.msra.mxu0 %v3959_v2  ;;  %3583 = vmatprep.mubr.f32.mxu0 %v1577_v49  ;;  %v4140_v2 = vld [vmem:[#allocation3 + $0x18] sm:$0xff]  ;;  %v4146_v49 = vld [vmem:[#allocation3 + $0x48] sm:$0xff] }
 0x364   :  { %3964 = vmatprep.subr.bf16.mxu0 %v3963_v17 }
 0x366   :  { %3584 = vmatmul.mubr.f32.vlgmr.msra.gmra.mrb[16].mxu0 %v1578_v22  ;;  %v4148_v22 = vld [vmem:[#allocation3 + $0x58] sm:$0xff] }
 0x367   :  { %3586 = vmatprep.mubr.f32.mxu0 %v1579_v30  ;;  %3966 = vmatpush3.bf16.msra.mxu0 %v3963_v17  ;;  %v4143_v17 = vld [vmem:[#allocation3 + $0x30] sm:$0xff] }
 0x368   :  { %3968 = vmatprep.subr.bf16.mxu0 %v3967_v33  ;;  %v4151_v30 = vld [vmem:[#allocation3 + $0x70] sm:$0xff] }
 0x36a   :  { %3587 = vmatmul.mubr.f32.gmra.mrb[18].mxu0 %v1580_v7 }
 0x36b   :  { %3589 = vmatprep.mubr.f32.mxu0 %v1581_v39  ;;  %3970 = vmatpush3.bf16.msra.mxu0 %v3967_v33  ;;  %v4147_v33 = vld [vmem:[#allocation3 + $0x50] sm:$0xff] }
 0x36c   :  { %3972 = vmatprep.subr.bf16.mxu0 %v3971_v5 }
 0x36e   :  { %3590 = vmatmul.mubr.f32.gmra.mrb[20].mxu0 %v1582_v18 }
 0x36f   :  { %3592 = vmatprep.mubr.f32.mxu0 %v1583_v8  ;;  %3974 = vmatpush3.bf16.msra.mxu0 %v3971_v5  ;;  %v4152_v5 = vld [vmem:[#allocation3 + $0x78] sm:$0xff] }
 0x370   :  { %3976 = vmatprep.subr.bf16.mxu0 %v3975_v50 }
 0x372   :  { %3593 = vmatmul.mubr.f32.gmra.mrb[22].mxu0 %v1584_v48 }
 0x373   :  { %3595 = vmatprep.mubr.f32.mxu0 %v1585_v23  ;;  %3978 = vmatpush3.bf16.msra.mxu0 %v3975_v50 }
 0x374   :  { %3980 = vmatprep.subr.bf16.mxu0 %v3979_v21 }
 0x376   :  { %3596 = vmatmul.mubr.f32.gmra.mrb[24].mxu0 %v1586_v59 }
 0x377   :  { %3598 = vmatprep.mubr.f32.mxu0 %v1587_v29  ;;  %3982 = vmatpush3.bf16.msra.mxu0 %v3979_v21 }
 0x378   :  { %3984 = vmatprep.subr.bf16.mxu0 %v3983_v27 }
 0x37a   :  { %3599 = vmatmul.mubr.f32.gmra.mrb[26].mxu0 %v1588_v34 }
 0x37b   :  { %3601 = vmatprep.mubr.f32.mxu0 %v1589_v37  ;;  %3986 = vmatpush3.bf16.msra.mxu0 %v3983_v27 }
 0x37c   :  { %3988 = vmatprep.subr.bf16.mxu0 %v3987_v31 }
 0x37e   :  { %3602 = vmatmul.mubr.f32.gmra.mrb[28].mxu0 %v1590_v52 }
 0x37f   :  { %3604 = vmatprep.mubr.f32.mxu0 %v1591_v57  ;;  %3990 = vmatpush3.bf16.msra.mxu0 %v3987_v31 }
 0x380   :  { %3992 = vmatprep.subr.bf16.mxu0 %v3991_v38 }
 0x382   :  { %3605 = vmatmul.mubr.f32.gmra.mrb[30].mxu0 %v1592_v56 }
 0x383   :  { %3994 = vmatpush3.bf16.msra.mxu0 %v3991_v38  ;;  %3639 = vmatprep.mubr.f32.mxu0 %v1932_v9 }
 0x384   :  { %3663 = vmatprep.subr.msk.mxu0 %vm183_vm0, %v2236_v0 }
 0x386   :  { %3640 = vmatmul.mubr.f32.vlgmr.msra.gmra.mrb[16].mxu0 %v1933_v62 }
 0x387   :  { %3642 = vmatprep.mubr.f32.mxu0 %v1934_v32  ;;  %3664 = vmatpush3.msk.msra.mxu0 %vm183_vm0, %v2236_v0  ;;  %v2730_v32 = vld [vmem:[#allocation12] sm:$0xff] }
 0x388   :  { %3689 = vmatprep.subr.mxu0 %v4326_v42 }
 0x38a   :  { %3643 = vmatmul.mubr.f32.gmra.mrb[18].mxu0 %v1935_v6  ;;  %v2731_v6 = vld [vmem:[#allocation12 + $0x8] sm:$0xff] }
 0x38b   :  { %3645 = vmatprep.mubr.f32.mxu0 %v1936_v16  ;;  %v2732_v16 = vld [vmem:[#allocation12 + $0x10] sm:$0xff] }
 0x38e   :  { %3646 = vmatmul.mubr.f32.gmra.mrb[20].mxu0 %v1937_v14 }
 0x38f   :  { %3648 = vmatprep.mubr.f32.mxu0 %v1938_v44 }
 0x392   :  { %3649 = vmatmul.mubr.f32.gmra.mrb[22].mxu0 %v1939_v15 }
 0x393   :  { %3651 = vmatprep.mubr.f32.mxu0 %v1940_v24  ;;  %v4328_v24 = vmov 0.0|0.0  }
 0x394   :  { %3995 = vmatprep.subr.bf16.mxu1 %v4328_v24 }
 0x396   :  { %3652 = vmatmul.mubr.f32.gmra.mrb[24].mxu0 %v1941_v45  ;;  %v3996_v45 = vpack.c.bf16 %v2731_v6, %v2730_v32 }
 0x397   :  { %3654 = vmatprep.mubr.f32.mxu0 %v1942_v47  ;;  %v2733_v47 = vld [vmem:[#allocation12 + $0x18] sm:$0xff] }
 0x398   :  { %3997 = vmatpush3.bf16.msra.mxu1 %v3996_v45 }
 0x399   :  { %3998 = vmatprep.subr.bf16.mxu1 %v4328_v24 }
 0x39a   :  { %3655 = vmatmul.mubr.f32.gmra.mrb[26].mxu0 %v1943_v51 }
 0x39b   :  { %3657 = vmatprep.mubr.f32.mxu0 %v1944_v53 }
 0x39e   :  { %3658 = vmatmul.mubr.f32.gmra.mrb[28].mxu0 %v1945_v54 }
 0x39f   :  { %3660 = vmatprep.mubr.f32.mxu0 %v1946_v55 }
 0x3a2   :  { %3661 = vmatmul.mubr.f32.gmra.mrb[30].mxu0 %v1947_v58 }
 0x3a3   :  { %3665 = vmatprep.mubr.msk.f32.mxu0 %vm2237_vm4, %v4137_v61  ;;  %v2734_v61 = vld [vmem:[#allocation12 + $0x20] sm:$0xff] }
 0x3a6   :  { %3666 = vmatmul.mubr.msk.f32.vlgmr.msra.gmra.mrb[32].mxu0 %vm2237_vm4, %v4138_v1  ;;  %v2735_v1 = vld [vmem:[#allocation12 + $0x28] sm:$0xff] }
 0x3a7   :  { %3668 = vmatprep.mubr.msk.f32.mxu0 %vm2237_vm4, %v4139_v60 }
 0x3aa   :  { %3669 = vmatmul.mubr.msk.f32.gmra.mrb[34].mxu0 %vm2237_vm4, %v4140_v2 }
 0x3ab   :  { %3671 = vmatprep.mubr.msk.f32.mxu0 %vm2237_vm4, %v4141_v19 }
 0x3ae   :  { %3672 = vmatmul.mubr.msk.f32.gmra.mrb[36].mxu0 %vm2237_vm4, %v4142_v40 }
 0x3af   :  { %3674 = vmatprep.mubr.msk.f32.mxu0 %vm2237_vm4, %v4143_v17 }
 0x3b2   :  { %3675 = vmatmul.mubr.msk.f32.gmra.mrb[38].mxu0 %vm2237_vm4, %v4144_v26 }
 0x3b3   :  { %3677 = vmatprep.mubr.msk.f32.mxu0 %vm2237_vm4, %v4145_v25 }
 0x3b6   :  { %3678 = vmatmul.mubr.msk.f32.gmra.mrb[40].mxu0 %vm2237_vm4, %v4146_v49  ;;  %v4002_v49 = vpack.c.bf16 %v2735_v1, %v2734_v61 }
 0x3b7   :  { %3680 = vmatprep.mubr.msk.f32.mxu0 %vm2237_vm4, %v4147_v33 }
 0x3ba   :  { %3681 = vmatmul.mubr.msk.f32.gmra.mrb[42].mxu0 %vm2237_vm4, %v4148_v22  ;;  %v2736_v22 = vld [vmem:[#allocation12 + $0x30] sm:$0xff] }
 0x3bb   :  { %3683 = vmatprep.mubr.msk.f32.mxu0 %vm2237_vm4, %v4149_v4  ;;  %v2737_v4 = vld [vmem:[#allocation12 + $0x38] sm:$0xff] }
 0x3be   :  { %3684 = vmatmul.mubr.msk.f32.gmra.mrb[44].mxu0 %vm2237_vm4, %v4150_v41 }
 0x3bf   :  { %3686 = vmatprep.mubr.msk.f32.mxu0 %vm2237_vm4, %v4151_v30 }
 0x3c2   :  { %3687 = vmatmul.mubr.msk.f32.gmra.mrb[46].mxu0 %vm2237_vm4, %v4152_v5 }
 0x3c3   :  { %3691 = vmatprep.mubr.msk.f32.mxu0 %vm4327_vm5, %v4326_v42  ;;  %v3999_v42 = vpack.c.bf16 %v2733_v47, %v2732_v16 }
 0x3c5   :  { %4000 = vmatpush3.bf16.msra.mxu1 %v3999_v42 }
 0x3c6   :  { %4001 = vmatprep.subr.bf16.mxu1 %v4328_v24 }
 0x3c9   :  { %4003 = vmatpush3.bf16.msra.mxu1 %v4002_v49 }
 0x3ca   :  { %4004 = vmatprep.subr.bf16.mxu1 %v4328_v24 }
 0x459   :  { %v4840_v7 = vpop.f32.mrb[16].mxu0 }
 0x45a   :  { %v2149_v10 = vmul.f32 %v4840_v7, %v4840_v7  ;;  %v4844_v11 = vpop.f32.mrb[17].mxu0 }
 0x45b   :  { %v2126_v39 = vadd.f32 %v4840_v7, %v4844_v11  ;;  %v2148_v50 = vmul.f32 %v4844_v11, %v4844_v11 }
 0x45d   :  { %v2164_v18 = vadd.f32 %v2149_v10, %v2148_v50  ;;  %v4850_v43 = vpop.f32.mrb[18].mxu0 }
 0x45e   :  { %v4852_v20 = vpop.f32.mrb[19].mxu0  ;;  %v2151_v48 = vmul.f32 %v4850_v43, %v4850_v43 }
 0x45f   :  { %v2127_v8 = vadd.f32 %v2126_v39, %v4852_v20  ;;  %v2150_v21 = vmul.f32 %v4852_v20, %v4852_v20 }
 0x461   :  { %v2165_v46 = vadd.f32 %v2164_v18, %v2150_v21  ;;  %v4859_v63 = vpop.f32.mrb[20].mxu0  ;;  %v2128_v23 = vadd.f32 %v4850_v43, %v2127_v8  ;;  %v4005_v8 = vpack.c.bf16 %v2737_v4, %v2736_v22 }
 0x462   :  { %v4862_v27 = vpop.f32.mrb[21].mxu0  ;;  %v2153_v29 = vmul.f32 %v4859_v63, %v4859_v63 }
 0x463   :  { %v2129_v59 = vadd.f32 %v2128_v23, %v4862_v27  ;;  %v2152_v3 = vmul.f32 %v4862_v27, %v4862_v27  ;;  %v2166_v28 = vadd.f32 %v2165_v46, %v2151_v48  ;;  %v2738_v48 = vld [vmem:[#allocation12 + $0x40] sm:$0xff]  ;;  %v2739_v46 = vld [vmem:[#allocation12 + $0x48] sm:$0xff]  ;;  %4006 = vmatpush3.bf16.msra.mxu1 %v4005_v8 }
 0x464   :  { %4007 = vmatprep.subr.bf16.mxu1 %v4328_v24 }
 0x465   :  { %v2167_v31 = vadd.f32 %v2166_v28, %v2152_v3  ;;  %v4869_v34 = vpop.f32.mrb[22].mxu0  ;;  %v2130_v35 = vadd.f32 %v4859_v63, %v2129_v59 }
 0x466   :  { %v4872_v36 = vpop.f32.mrb[23].mxu0  ;;  %v2155_v57 = vmul.f32 %v4869_v34, %v4869_v34 }
 0x467   :  { %v2131_v37 = vadd.f32 %v2130_v35, %v4872_v36  ;;  %v2154_v38 = vmul.f32 %v4872_v36, %v4872_v36  ;;  %v2168_v52 = vadd.f32 %v2167_v31, %v2153_v29 }
 0x469   :  { %v2169_v56 = vadd.f32 %v2168_v52, %v2154_v38  ;;  %v4879_v0 = vpop.f32.mrb[24].mxu0  ;;  %v2132_v9 = vadd.f32 %v4869_v34, %v2131_v37  ;;  %v4008_v37 = vpack.c.bf16 %v2739_v46, %v2738_v48 }
 0x46a   :  { %v4882_v62 = vpop.f32.mrb[25].mxu0  ;;  %v2157_v51 = vmul.f32 %v4879_v0, %v4879_v0 }
 0x46b   :  { %v2133_v14 = vadd.f32 %v2132_v9, %v4882_v62  ;;  %v2156_v44 = vmul.f32 %v4882_v62, %v4882_v62  ;;  %v2170_v15 = vadd.f32 %v2169_v56, %v2155_v57  ;;  %v2740_v57 = vld [vmem:[#allocation12 + $0x50] sm:$0xff]  ;;  %v2741_v56 = vld [vmem:[#allocation12 + $0x58] sm:$0xff]  ;;  %4009 = vmatpush3.bf16.msra.mxu1 %v4008_v37 }
 0x46c   :  { %v4011_v47 = vpack.c.bf16 %v2741_v56, %v2740_v57  ;;  %4010 = vmatprep.subr.bf16.mxu1 %v4328_v24 }
 0x46d   :  { %v2171_v53 = vadd.f32 %v2170_v15, %v2156_v44  ;;  %v4892_v54 = vpop.f32.mrb[26].mxu0  ;;  %v2134_v55 = vadd.f32 %v4879_v0, %v2133_v14 }
 0x46e   :  { %v4895_v58 = vpop.f32.mrb[27].mxu0  ;;  %v2159_v40 = vmul.f32 %v4892_v54, %v4892_v54 }
 0x46f   :  { %v2135_v60 = vadd.f32 %v2134_v55, %v4895_v58  ;;  %v2158_v2 = vmul.f32 %v4895_v58, %v4895_v58  ;;  %v2172_v19 = vadd.f32 %v2171_v53, %v2157_v51  ;;  %v2742_v51 = vld [vmem:[#allocation12 + $0x60] sm:$0xff]  ;;  %v2743_v53 = vld [vmem:[#allocation12 + $0x68] sm:$0xff]  ;;  %4012 = vmatpush3.bf16.msra.mxu1 %v4011_v47 }
 0x470   :  { %4013 = vmatprep.subr.bf16.mxu1 %v4328_v24 }
 0x471   :  { %v2173_v17 = vadd.f32 %v2172_v19, %v2158_v2  ;;  %v4903_v26 = vpop.f32.mrb[28].mxu0  ;;  %v2136_v25 = vadd.f32 %v4892_v54, %v2135_v60  ;;  %v4014_v2 = vpack.c.bf16 %v2743_v53, %v2742_v51 }
 0x472   :  { %v4906_v33 = vpop.f32.mrb[29].mxu0  ;;  %v2161_v10 = vmul.f32 %v4903_v26, %v4903_v26 }
 0x473   :  { %v2137_v41 = vadd.f32 %v2136_v25, %v4906_v33  ;;  %v2160_v30 = vmul.f32 %v4906_v33, %v4906_v33  ;;  %v2174_v5 = vadd.f32 %v2173_v17, %v2159_v40  ;;  %4015 = vmatpush3.bf16.msra.mxu1 %v4014_v2 }
 0x474   :  { %4016 = vmatprep.subr.bf16.mxu1 %v4328_v24 }
 0x475   :  { %v2175_v39 = vadd.f32 %v2174_v5, %v2160_v30  ;;  %v4914_v50 = vpop.f32.mrb[30].mxu0  ;;  %v2138_v18 = vadd.f32 %v4903_v26, %v2137_v41  ;;  %v2744_v41 = vld [vmem:[#allocation12 + $0x70] sm:$0xff]  ;;  %v2745_v30 = vld [vmem:[#allocation12 + $0x78] sm:$0xff] }
 0x476   :  { %v4917_v21 = vpop.f32.mrb[31].mxu0  ;;  %v2163_v28 = vmul.f32 %v4914_v50, %v4914_v50 }
 0x477   :  { %v2139_v23 = vadd.f32 %v2138_v18, %v4917_v21  ;;  %v2162_v59 = vmul.f32 %v4917_v21, %v4917_v21  ;;  %v2176_v3 = vadd.f32 %v2175_v39, %v2161_v10 }
 0x479   :  { %v2140_v29 = vadd.f32 %v4914_v50, %v2139_v23  ;;  %v2177_v31 = vadd.f32 %v2176_v3, %v2162_v59  ;;  %v4926_v35 = vpop.f32.mrb[32].mxu0  ;;  %v4017_v3 = vpack.c.bf16 %v2745_v30, %v2744_v41 }
 0x47a   :  { %v2441_v38 = vmul.f32 %v4926_v35, %v4926_v35  ;;  %v4930_v52 = vpop.f32.mrb[33].mxu0 }
 0x47b   :  { %v2141_v9 = vrot.slane %v2140_v29, 4  ;;  %v2178_v32 = vadd.f32 %v2177_v31, %v2163_v28  ;;  %v2418_v6 = vadd.f32 %v4926_v35, %v4930_v52  ;;  %v2440_v16 = vmul.f32 %v4930_v52, %v4930_v52  ;;  %4018 = vmatpush3.bf16.msra.mxu1 %v4017_v3 }
 0x47d   :  { %v2142_v14 = vadd.f32 %v2141_v9, %v2140_v29  ;;  %v2179_v44 = vrot.slane %v2178_v32, 4  ;;  %v2456_v15 = vadd.f32 %v2441_v38, %v2440_v16  ;;  %v4937_v45 = vpop.f32.mrb[34].mxu0 }
 0x47e   :  { %v4939_v55 = vpop.f32.mrb[35].mxu0  ;;  %v2443_v22 = vmul.f32 %v4937_v45, %v4937_v45 }
 0x47f   :  { %v2143_v42 = vrot.slane %v2142_v14, 2  ;;  %v2180_v61 = vadd.f32 %v2179_v44, %v2178_v32  ;;  %v2419_v1 = vadd.f32 %v2418_v6, %v4939_v55  ;;  %v2442_v60 = vmul.f32 %v4939_v55, %v4939_v55 }
 0x481   :  { %v2144_v19 = vadd.f32 %v2143_v42, %v2142_v14  ;;  %v2181_v40 = vrot.slane %v2180_v61, 2  ;;  %v2457_v17 = vadd.f32 %v2456_v15, %v2442_v60  ;;  %v4945_v25 = vpop.f32.mrb[36].mxu0  ;;  %v2420_v49 = vadd.f32 %v4937_v45, %v2419_v1 }
 0x482   :  { %v4950_v4 = vpop.f32.mrb[37].mxu0  ;;  %v2445_v28 = vmul.f32 %v4945_v25, %v4945_v25 }
 0x483   :  { %v2145_v5 = vrot.slane %v2144_v19, 1  ;;  %v2182_v10 = vadd.f32 %v2181_v40, %v2180_v61  ;;  %v2421_v39 = vadd.f32 %v2420_v49, %v4950_v4  ;;  %v2444_v18 = vmul.f32 %v4950_v4, %v4950_v4 }
 0x484   :  { %v2458_v8 = vadd.f32 %v2457_v17, %v2443_v22 }
 0x485   :  { %v2146_v48 = vadd.f32 %v2145_v5, %v2144_v19  ;;  %v2183_v46 = vrot.slane %v2182_v10, 1  ;;  %v4956_v23 = vpop.f32.mrb[38].mxu0  ;;  %v2422_v59 = vadd.f32 %v4945_v25, %v2421_v39 }
 0x486   :  { %v2459_v29 = vadd.f32 %v2458_v8, %v2444_v18  ;;  %v4961_v31 = vpop.f32.mrb[39].mxu0  ;;  %v2447_v44 = vmul.f32 %v4956_v23, %v4956_v23 }
 0x487   :  { %v2147_v37 = vmul.f32 0.0078125, %v2146_v48  ;;  %v2184_v38 = vadd.f32 %v2183_v46, %v2182_v10  ;;  %v2423_v57 = vadd.f32 %v2422_v59, %v4961_v31  ;;  %v2446_v56 = vmul.f32 %v4961_v31, %v4961_v31 }
 0x488   :  { %v2460_v9 = vadd.f32 %v2459_v29, %v2445_v28 }
 0x489   :  { %v2185_v32 = vmul.f32 0.0078125, %v2184_v38  ;;  %v2186_v6 = vmul.f32 %v2147_v37, %v2147_v37  ;;  %v4967_v16 = vpop.f32.mrb[40].mxu0  ;;  %v2424_v14 = vadd.f32 %v4956_v23, %v2423_v57 }
 0x48a   :  { %v2461_v15 = vadd.f32 %v2460_v9, %v2446_v56  ;;  %v4972_v24 = vpop.f32.mrb[41].mxu0  ;;  %v2449_v2 = vmul.f32 %v4967_v16, %v4967_v16  ;;  %v2198_v56 = vsub.s32 2, %v4576_v12 }
 0x48b   :  { %v2187_v47 = vsub.f32 %v2185_v32, %v2186_v6  ;;  %v2425_v51 = vadd.f32 %v2424_v14, %v4972_v24  ;;  %v2448_v53 = vmul.f32 %v4972_v24, %v4972_v24 }
 0x48c   :  { %v2462_v42 = vadd.f32 %v2461_v15, %v2447_v44 }
 0x48d   :  { %v2188_v61 = vadd.f32 1e-05, %v2187_v47  ;;  %v4977_v1 = vpop.f32.mrb[42].mxu0  ;;  %v2426_v60 = vadd.f32 %v4967_v16, %v2425_v51 }
 0x48e   :  { %v2463_v19 = vadd.f32 %v2462_v42, %v2448_v53  ;;  %v4982_v40 = vpop.f32.mrb[43].mxu0  ;;  %v2451_v5 = vmul.f32 %v4977_v1, %v4977_v1 }
 0x48f   :  { %4132 = vrsqrt.f32 %v2188_v61  ;;  %v2427_v17 = vadd.f32 %v2426_v60, %v4982_v40  ;;  %v2450_v49 = vmul.f32 %v4982_v40, %v4982_v40  ;;  %v2218_v61 = vsub.s32 6, %v4576_v12 }
 0x490   :  { %v2464_v22 = vadd.f32 %v2463_v19, %v2449_v2 }
 0x491   :  { %v4987_v41 = vpop.f32.mrb[44].mxu0  ;;  %v2428_v30 = vadd.f32 %v4977_v1, %v2427_v17 }
 0x492   :  { %v2465_v10 = vadd.f32 %v2464_v22, %v2450_v49  ;;  %v4992_v39 = vpop.f32.mrb[45].mxu0  ;;  %v2453_v3 = vmul.f32 %v4987_v41, %v4987_v41 }
 0x493   :  { %v2429_v18 = vadd.f32 %v2428_v30, %v4992_v39  ;;  %v2452_v8 = vmul.f32 %v4992_v39, %v4992_v39 }
 0x494   :  { %v2466_v48 = vadd.f32 %v2465_v10, %v2451_v5 }
 0x495   :  { %v4997_v46 = vpop.f32.mrb[46].mxu0  ;;  %v2430_v59 = vadd.f32 %v4987_v41, %v2429_v18 }
 0x496   :  { %v2467_v28 = vadd.f32 %v2466_v48, %v2452_v8  ;;  %v5002_v29 = vpop.f32.mrb[47].mxu0  ;;  %v2455_v44 = vmul.f32 %v4997_v46, %v4997_v46 }
 0x497   :  { %v2431_v38 = vadd.f32 %v2430_v59, %v5002_v29  ;;  %v2454_v57 = vmul.f32 %v5002_v29, %v5002_v29 }
 0x498   :  { %v2468_v9 = vadd.f32 %v2467_v28, %v2453_v3 }
 0x499   :  { %v4133_v32 = vpop.eup %4132  ;;  %v2432_v6 = vadd.f32 %v4997_v46, %v2431_v38 }
 0x49a   :  { %v2190_v14 = vmul.f32 %v4793_v13, %v4133_v32  ;;  %v2469_v15 = vadd.f32 %v2468_v9, %v2454_v57 }
 0x49b   :  { %v2433_v47 = vrot.slane %v2432_v6, 4 }
 0x49c   :  { %v2191_v51 = vmul.f32 %v2190_v14, %v2147_v37  ;;  %v2199_v53 = vrot.slane %v2190_v14, %v2198_v56  ;;  %v2470_v42 = vadd.f32 %v2469_v15, %v2455_v44 }
 0x49d   :  { %v2434_v60 = vadd.f32 %v2433_v47, %v2432_v6 }
 0x49e   :  { %v2193_v2 = vrot.slane %v2191_v51, 4  ;;  %v2214_v19 = vmul.f32 %v2199_v53, %v4917_v21  ;;  %v2215_v17 = vmul.f32 %v4914_v50, %v2199_v53  ;;  %v2471_v49 = vrot.slane %v2470_v42, 4 }
 0x49f   :  { %v2435_v22 = vrot.slane %v2434_v60, 2  ;;  %v2200_v30 = vmul.f32 %v2199_v53, %v4844_v11  ;;  %v2201_v5 = vmul.f32 %v4840_v7, %v2199_v53  ;;  %v2202_v10 = vmul.f32 %v2199_v53, %v4852_v20 }
 0x4a0   :  { %v2195_v37 = vsub.f32 %v4793_v13, %v2193_v2  ;;  %v2472_v18 = vadd.f32 %v2471_v49, %v2470_v42  ;;  %v2203_v8 = vmul.f32 %v4850_v43, %v2199_v53  ;;  %v2204_v48 = vmul.f32 %v2199_v53, %v4862_v27 }
 0x4a1   :  { %v2436_v59 = vadd.f32 %v2435_v22, %v2434_v60  ;;  %v2205_v21 = vmul.f32 %v4859_v63, %v2199_v53  ;;  %v2206_v50 = vmul.f32 %v2199_v53, %v4872_v36  ;;  %v2207_v3 = vmul.f32 %v4869_v34, %v2199_v53  ;;  %v2624_v22 = vld [vmem:[#allocation6] sm:$0xff] }
 0x4a2   :  { %v2219_v28 = vrot.slane %v2195_v37, %v2218_v61  ;;  %v2473_v11 = vrot.slane %v2472_v18, 2  ;;  %v2208_v7 = vmul.f32 %v2199_v53, %v4882_v62  ;;  %v2209_v20 = vmul.f32 %v4879_v0, %v2199_v53 }
 0x4a3   :  { %v2437_v38 = vrot.slane %v2436_v59, 1  ;;  %v2210_v57 = vmul.f32 %v2199_v53, %v4895_v58  ;;  %v2211_v43 = vmul.f32 %v4892_v54, %v2199_v53  ;;  %v2212_v27 = vmul.f32 %v2199_v53, %v4906_v33 }
 0x4a4   :  { %v5029_v56 = vadd.f32 %v2219_v28, %v2214_v19  ;;  %v5031_v63 = vadd.f32 %v2219_v28, %v2215_v17  ;;  %v2474_v36 = vadd.f32 %v2473_v11, %v2472_v18  ;;  %v2213_v34 = vmul.f32 %v4903_v26, %v2199_v53 }
 0x4a5   :  { %v2438_v9 = vadd.f32 %v2437_v38, %v2436_v59  ;;  %v5034_v32 = vadd.f32 %v2219_v28, %v2200_v30  ;;  %v5036_v62 = vadd.f32 %v2219_v28, %v2201_v5  ;;  %v5038_v0 = vadd.f32 %v2219_v28, %v2202_v10 }
 0x4a6   :  { %v2475_v6 = vrot.slane %v2474_v36, 1  ;;  %v5040_v58 = vadd.f32 %v2219_v28, %v2203_v8  ;;  %v5042_v54 = vadd.f32 %v2219_v28, %v2204_v48  ;;  %v5044_v33 = vadd.f32 %v2219_v28, %v2205_v21 }
 0x4a7   :  { %v2439_v14 = vmul.f32 0.0078125, %v2438_v9  ;;  %v5046_v44 = vadd.f32 %v2219_v28, %v2206_v50  ;;  %v5048_v15 = vadd.f32 %v2219_v28, %v2207_v3  ;;  %v5050_v26 = vadd.f32 %v2219_v28, %v2208_v7 }
 0x4a8   :  { %v2476_v47 = vadd.f32 %v2475_v6, %v2474_v36  ;;  %v5052_v51 = vadd.f32 %v2219_v28, %v2209_v20  ;;  %v5054_v53 = vadd.f32 %v2219_v28, %v2210_v57  ;;  %v5056_v42 = vadd.f32 %v2219_v28, %v2211_v43 }
 0x4a9   :  { %v2478_v61 = vmul.f32 %v2439_v14, %v2439_v14  ;;  %v5058_v60 = vadd.f32 %v2219_v28, %v2212_v27  ;;  %v5060_v2 = vadd.f32 %v2219_v28, %v2213_v34  ;;  %v2490_v30 = vsub.s32 3, %v4576_v12 }
 0x4aa   :  { %v2477_v19 = vmul.f32 0.0078125, %v2476_v47  ;;  %v2626_v37 = vsel %vm2625_vm6, %v2624_v22, 0.0  ;;  %v2510_v48 = vsub.s32 7, %v4576_v12 }
 0x4ab   :  { %v2627_v59 = vrot.slane %v2626_v37, 4 }
 0x4ac   :  { %v2479_v17 = vsub.f32 %v2477_v19, %v2478_v61 }
 0x4ae   :  { %v2480_v49 = vadd.f32 1e-05, %v2479_v17 }
 0x4b0   :  { %4134 = vrsqrt.f32 %v2480_v49 }
 0x4ba   :  { %v4135_v5 = vpop.eup %4134 }
 0x4bb   :  { %v2482_v10 = vmul.f32 %v4793_v13, %v4135_v5 }
 0x4bd   :  { %v2483_v18 = vmul.f32 %v2482_v10, %v2439_v14  ;;  %v2491_v8 = vrot.slane %v2482_v10, %v2490_v30 }
 0x4bf   :  { %v2485_v21 = vrot.slane %v2483_v18, 4  ;;  %v2506_v50 = vmul.f32 %v2491_v8, %v5002_v29  ;;  %v2507_v3 = vmul.f32 %v4997_v46, %v2491_v8  ;;  %v2492_v28 = vmul.f32 %v2491_v8, %v4930_v52 }
 0x4c0   :  { %v2493_v11 = vmul.f32 %v4926_v35, %v2491_v8  ;;  %v2494_v7 = vmul.f32 %v2491_v8, %v4939_v55  ;;  %v2495_v20 = vmul.f32 %v4937_v45, %v2491_v8  ;;  %v2496_v38 = vmul.f32 %v2491_v8, %v4950_v4 }
 0x4c1   :  { %v2487_v57 = vsub.f32 %v4793_v13, %v2485_v21  ;;  %v2497_v12 = vmul.f32 %v4945_v25, %v2491_v8  ;;  %v2498_v43 = vmul.f32 %v2491_v8, %v4961_v31  ;;  %v2499_v29 = vmul.f32 %v4956_v23, %v2491_v8 }
 0x4c2   :  { %v2500_v46 = vmul.f32 %v2491_v8, %v4972_v24  ;;  %v2501_v52 = vmul.f32 %v4967_v16, %v2491_v8  ;;  %v2502_v35 = vmul.f32 %v2491_v8, %v4982_v40  ;;  %v2503_v55 = vmul.f32 %v4977_v1, %v2491_v8 }
 0x4c3   :  { %v2511_v27 = vrot.slane %v2487_v57, %v2510_v48  ;;  %v2504_v45 = vmul.f32 %v2491_v8, %v4992_v39  ;;  %v2505_v4 = vmul.f32 %v4987_v41, %v2491_v8  ;;  %v5083_v13 = vadd.f32 %v2627_v59, %v2626_v37 }
 0x4c5   :  { %v2526_v25 = vadd.f32 %v2511_v27, %v2506_v50  ;;  %v2527_v36 = vadd.f32 %v2511_v27, %v2507_v3  ;;  %v2512_v31 = vadd.f32 %v2511_v27, %v2492_v28  ;;  %v2513_v34 = vadd.f32 %v2511_v27, %v2493_v11 }
 0x4c6   :  { %v2514_v23 = vadd.f32 %v2511_v27, %v2494_v7  ;;  %v2515_v9 = vadd.f32 %v2511_v27, %v2495_v20  ;;  %v2516_v24 = vadd.f32 %v2511_v27, %v2496_v38  ;;  %v2517_v6 = vadd.f32 %v2511_v27, %v2497_v12 }
 0x4c7   :  { %v2542_v16 = vadd.f32 %v2526_v25, %v5029_v56  ;;  %v2543_v40 = vadd.f32 %v2527_v36, %v5031_v63  ;;  %v2518_v1 = vadd.f32 %v2511_v27, %v2498_v43  ;;  %v2519_v14 = vadd.f32 %v2511_v27, %v2499_v29 }
 0x4c8   :  { %v2520_v47 = vadd.f32 %v2511_v27, %v2500_v46  ;;  %v2521_v39 = vadd.f32 %v2511_v27, %v2501_v52  ;;  %v2522_v61 = vadd.f32 %v2511_v27, %v2502_v35  ;;  %v2523_v41 = vadd.f32 %v2511_v27, %v2503_v55 }
 0x4c9   :  { %v2558_v19 = vmax.f32 %v2542_v16, 0.0  ;;  %v2559_v17 = vmax.f32 %v2543_v40, 0.0  ;;  %v2524_v49 = vadd.f32 %v2511_v27, %v2504_v45  ;;  %v2525_v22 = vadd.f32 %v2511_v27, %v2505_v4 }
 0x4ca   :  { %v2528_v30 = vadd.f32 %v2512_v31, %v5034_v32  ;;  %v2529_v5 = vadd.f32 %v2513_v34, %v5036_v62  ;;  %v2530_v10 = vadd.f32 %v2514_v23, %v5038_v0  ;;  %v2531_v56 = vadd.f32 %v2515_v9, %v5040_v58 }
 0x4cb   :  { %v2609_v37 = vadd.f32 %v2559_v17, %v2558_v19  ;;  %v2532_v63 = vadd.f32 %v2516_v24, %v5042_v54  ;;  %v2533_v18 = vadd.f32 %v2517_v6, %v5044_v33  ;;  %v2534_v8 = vadd.f32 %v2518_v1, %v5046_v44 }
 0x4cc   :  { %v2535_v48 = vadd.f32 %v2519_v14, %v5048_v15  ;;  %v2536_v59 = vadd.f32 %v2520_v47, %v5050_v26  ;;  %v2537_v21 = vadd.f32 %v2521_v39, %v5052_v51  ;;  %v2538_v32 = vadd.f32 %v2522_v61, %v5054_v53 }
 0x4cd   :  { %v2610_v62 = vrot.slane %v2609_v37, 4  ;;  %v2539_v0 = vadd.f32 %v2523_v41, %v5056_v42  ;;  %v2540_v58 = vadd.f32 %v2524_v49, %v5058_v60  ;;  %v2541_v50 = vadd.f32 %v2525_v22, %v5060_v2 }
 0x4ce   :  { %v2544_v54 = vmax.f32 %v2528_v30, 0.0  ;;  %v2545_v3 = vmax.f32 %v2529_v5, 0.0  ;;  %v2546_v33 = vmax.f32 %v2530_v10, 0.0  ;;  %v2547_v28 = vmax.f32 %v2531_v56, 0.0 }
 0x4cf   :  { %v2611_v44 = vadd.f32 %v2610_v62, %v2609_v37  ;;  %v2548_v11 = vmax.f32 %v2532_v63, 0.0  ;;  %v2549_v15 = vmax.f32 %v2533_v18, 0.0  ;;  %v2550_v7 = vmax.f32 %v2534_v8, 0.0 }
 0x4d0   :  { %v2551_v26 = vmax.f32 %v2535_v48, 0.0  ;;  %v2552_v20 = vmax.f32 %v2536_v59, 0.0  ;;  %v2553_v51 = vmax.f32 %v2537_v21, 0.0  ;;  %v2554_v38 = vmax.f32 %v2538_v32, 0.0 }
 0x4d1   :  { %v2555_v53 = vmax.f32 %v2539_v0, 0.0  ;;  %v2556_v57 = vmax.f32 %v2540_v58, 0.0  ;;  %v2557_v12 = vmax.f32 %v2541_v50, 0.0  ;;  %v2560_v42 = vadd.f32 %v2545_v3, %v2544_v54 }
 0x4d2   :  { %v2567_v43 = vadd.f32 %v2547_v28, %v2546_v33  ;;  %v2574_v60 = vadd.f32 %v2549_v15, %v2548_v11  ;;  %v2581_v29 = vadd.f32 %v2551_v26, %v2550_v7  ;;  %v2588_v2 = vadd.f32 %v2553_v51, %v2552_v20 }
 0x4d3   :  { %v2561_v46 = vrot.slane %v2560_v42, 4  ;;  %v2595_v52 = vadd.f32 %v2555_v53, %v2554_v38  ;;  %v2602_v35 = vadd.f32 %v2557_v12, %v2556_v57  ;;  %v2629_v55 = vrot.slane %v5083_v13, 2 }
 0x4d4   :  { %v2568_v27 = vrot.slane %v2567_v43, 4  ;;  %v2575_v45 = vrot.slane %v2574_v60, 4  ;;  %v2582_v4 = vrot.slane %v2581_v29, 4  ;;  %v2589_v25 = vrot.slane %v2588_v2, 4 }
 0x4d5   :  { %v2562_v36 = vadd.f32 %v2561_v46, %v2560_v42  ;;  %v2596_v31 = vrot.slane %v2595_v52, 4  ;;  %v2603_v34 = vrot.slane %v2602_v35, 4  ;;  %v2612_v23 = vrot.slane %v2611_v44, 2 }
 0x4d6   :  { %v2569_v9 = vadd.f32 %v2568_v27, %v2567_v43  ;;  %v2576_v24 = vadd.f32 %v2575_v45, %v2574_v60  ;;  %v2583_v6 = vadd.f32 %v2582_v4, %v2581_v29  ;;  %v2590_v16 = vadd.f32 %v2589_v25, %v2588_v2  ;;  %v2746_v4 = vld [vmem:[%s5127_s8] sm:$0x1] }
 0x4d7   :  { %v2563_v40 = vrot.slane %v2562_v36, 2  ;;  %v2597_v1 = vadd.f32 %v2596_v31, %v2595_v52  ;;  %v2604_v14 = vadd.f32 %v2603_v34, %v2602_v35  ;;  %v2630_v47 = vadd.f32 %v2629_v55, %v5083_v13 }
 0x4d8   :  { %v2570_v39 = vrot.slane %v2569_v9, 2  ;;  %v2577_v61 = vrot.slane %v2576_v24, 2  ;;  %v2584_v41 = vrot.slane %v2583_v6, 2  ;;  %v2591_v19 = vrot.slane %v2590_v16, 2 }
 0x4d9   :  { %v2564_v17 = vadd.f32 %v2563_v40, %v2562_v36  ;;  %v2598_v49 = vrot.slane %v2597_v1, 2  ;;  %v2605_v22 = vrot.slane %v2604_v14, 2  ;;  %v2613_v30 = vadd.f32 %v2612_v23, %v2611_v44 }
 0x4da   :  { %v2571_v5 = vadd.f32 %v2570_v39, %v2569_v9  ;;  %v2578_v10 = vadd.f32 %v2577_v61, %v2576_v24  ;;  %v2585_v56 = vadd.f32 %v2584_v41, %v2583_v6  ;;  %v2592_v37 = vadd.f32 %v2591_v19, %v2590_v16 }
 0x4db   :  { %v2565_v63 = vrot.slane %v2564_v17, 1  ;;  %v2599_v18 = vadd.f32 %v2598_v49, %v2597_v1  ;;  %v2606_v8 = vadd.f32 %v2605_v22, %v2604_v14  ;;  %v2631_v58 = vrot.slane %v2630_v47, 1 }
 0x4dc   :  { %v2572_v48 = vrot.slane %v2571_v5, 1  ;;  %v2579_v59 = vrot.slane %v2578_v10, 1  ;;  %v2586_v21 = vrot.slane %v2585_v56, 1  ;;  %v2593_v32 = vrot.slane %v2592_v37, 1 }
 0x4dd   :  { %v2566_v13 = vadd.f32 %v2565_v63, %v2564_v17  ;;  %v2600_v62 = vrot.slane %v2599_v18, 1  ;;  %v2607_v0 = vrot.slane %v2606_v8, 1  ;;  %v2614_v33 = vrot.slane %v2613_v30, 1 }
 0x4de   :  { %v2573_v50 = vadd.f32 %v2572_v48, %v2571_v5  ;;  %v2580_v54 = vadd.f32 %v2579_v59, %v2578_v10  ;;  %v2587_v3 = vadd.f32 %v2586_v21, %v2585_v56  ;;  %v2594_v28 = vadd.f32 %v2593_v32, %v2592_v37 }
 0x4df   :  { %v2616_v44 = vmul.f32 0.0625, %v2566_v13  ;;  %v2601_v11 = vadd.f32 %v2600_v62, %v2599_v18  ;;  %v2608_v26 = vadd.f32 %v2607_v0, %v2606_v8  ;;  %v2615_v20 = vadd.f32 %v2614_v33, %v2613_v30 }
 0x4e0   :  { %v2617_v15 = vmul.f32 0.0625, %v2573_v50  ;;  %v2618_v7 = vmul.f32 0.0625, %v2580_v54  ;;  %v2619_v51 = vmul.f32 0.0625, %v2587_v3  ;;  %v2632_v53 = vadd.f32 %v2631_v58, %v2630_v47 }
 0x4e1   :  { %v2620_v57 = vmul.f32 0.0625, %v2594_v28  ;;  %v2621_v42 = vmul.f32 0.0625, %v2601_v11  ;;  %v2622_v60 = vmul.f32 0.0625, %v2608_v26  ;;  %v2623_v2 = vmul.f32 0.0625, %v2615_v20 }
 0x4e2   :  { %v2643_v38 = vsel %vm2642_vm7, %v2617_v15, %v2616_v44  ;;  %v2633_v52 = vmul.f32 0.125, %v2632_v53 }
 0x4e3   :  { %v2645_v12 = vsel %vm2644_vm8, %v2618_v7, %v2643_v38 }
 0x4e4   :  { %v2647_v43 = vsel %vm2646_vm9, %v2619_v51, %v2645_v12 }
 0x4e5   :  { %v2649_v29 = vsel %vm2648_vm10, %v2620_v57, %v2647_v43 }
 0x4e6   :  { %v2651_v46 = vsel %vm2650_vm11, %v2621_v42, %v2649_v29 }
 0x4e7   :  { %v2653_v35 = vsel %vm2652_vm12, %v2622_v60, %v2651_v46 }
 0x4e8   :  { %v2655_v55 = vsel %vm2654_vm13, %v2623_v2, %v2653_v35 }
 0x4e9   :  { %3690 = vmatpush3.msra.mxu0 %v2655_v55 }
 0x4ea   :  { %3692 = vmatmul.mubr.msk.f32.vlgmr.msra.gmra.mrb[48].mxu0 %vm2625_vm6, %v2633_v52 }
 0x5bd   :  { %v2726_v27 = vpop.f32.mrb[48].mxu0 }
 0x5be   :  { %v3693_v45 = vpop.f32.mrb[49].mxu0  ;;  %3727 = vmatmul.mubr.f32.vlgmr.msra.gmra.mrb[16].mxu1 %v2726_v27 }
 0x691   :  { %v2813_v25 = vpop.f32.mrb[16].mxu1 }
 0x692   :  { %v2814_v36 = vadd.f32 %v2813_v25, %v2746_v4  ;;  %v3728_v31 = vpop.f32.mrb[17].mxu1 }
 0x694   :  { %2817 = vst [vmem:[#allocation14] sm:$0x1] %v2814_v36 }
 0x695   :  { %4296 = shalt.err (!%p4293_p10)
}
 0x696   :  { %s4297_s22 = scalar_lea.hbm %s5128_s9, 16 }
 0x697   :  { %p4298_p11 = scmp.ne.s32.totalorder %s5128_s9, %s4297_s22  ;;  %p4301_p12 = scmp.lt.u32.totalorder %s4297_s22, %s5128_s9 }
 0x699   :  { %p4303_p13 = pnand %p4301_p12, %p4298_p11 }
 0x69b   :  { %4306 = shalt.err (!%p4303_p13)
}
 0x69c   :  { %2827 = dma.vmem_to_hbm [thread:$0]  %s2825_s19, 16, %s5128_s9, [#allocation5]  }
 0x69d   :  { %4315 = dma.done.wait [#allocation5], 16  }
 0x69e   :  { %4316 = vsyncadd [#allocation5], 4294967280 }
 0x69f   :  { %2831 = vsyncpa [#allocation4], 1 }
 0x6a0   :  { %2832 = vsyncpa [#allocation7], 1 }
 0x6a1   :  { %2833 = vsyncpa [#allocation10], 1 }
 0x6a2   :  { %2834 = vsyncpa [#allocation13], 1 }
 0x6a3   :  { %2835 = vsyncpa [#allocation5], 1 }

</bundles_post_ra>
